<compile_context>
chip_gen: v5e
topology: v5e:2x2
jax: 0.10.0
libtpu: 0.0.40
codegen_flags: <defaults>
</compile_context>

<pallas_src>
import functools

import jax
import jax.numpy as jnp
from jax import lax
from jax.experimental import pallas as pl
from jax.experimental.pallas import tpu as pltpu

LANE = 128


def _round_up(n, m):
    return ((n + m - 1) // m) * m


def _unroll(steps):
    # Full unroll for short recurrences (LLO scheduling visibility); partial beyond.
    return steps if steps <= 16 else 8


# ---------------------------------------------------------------------------
# Fused Pallas kernel
# ---------------------------------------------------------------------------

def parser_fused_kernel(x_ref, wihw_ref, whhw_ref, bw_ref,
                        wihs_ref, whhs_ref, bs_ref,
                        sf_ref, sb_ref,
                        w1_ref, b1_ref, w2_ref, b2_ref,
                        out_ref,
                        ginw_ref, gins_ref, hseq_ref,
                        *, char_len, rows_w, num_words, t_span, hw, hs):
    gw = 4 * hw
    gs = 4 * hs
    rows_s = 8

    # ---------------- WordRepresentation ----------------
    # Two unidirectional char LSTMs (suffix forward_lstm / prefix backward_lstm) batched
    # along sublanes.  Hoisted input projection + bias: ONE MXU matmul for all steps and
    # both streams, stored to a bf16 scratch.
    ginw_ref[...] = (
        jnp.dot(x_ref[...], wihw_ref[...], preferred_element_type=jnp.float32)
        + bw_ref[...]
    ).astype(jnp.bfloat16)

    whh_w = whhw_ref[...]
    row_is_suffix = lax.broadcasted_iota(jnp.int32, (rows_w, gw), 0) < num_words

    def word_step(t, carry):
        h, c = carry
        # Only the recurrent matmul stays on the serial critical path.
        hh = jnp.dot(h.astype(jnp.bfloat16), whh_w,
                     preferred_element_type=jnp.float32)                    # (rows_w, 8Hw)
        start = pl.multiple_of(t * rows_w, 16)
        full = ginw_ref[pl.ds(start, rows_w), :].astype(jnp.float32) + hh
        # Direction select: both halves are vreg-aligned 128-lane slices when 4H == 128.
        gates = jnp.where(row_is_suffix, full[:, :gw], full[:, gw:])        # (rows_w, 4Hw)
        # Gate order (i, f, o, g): one sigmoid over 3H, one tanh over the trailing H.
        # TODO(synk): real configs should keep H a multiple of 128 to avoid the per-step
        # lane realignment of the f/o/g sub-slices below.
        ifo = jax.nn.sigmoid(gates[:, :3 * hw])
        g_g = jnp.tanh(gates[:, 3 * hw:])
        c_new = ifo[:, hw:2 * hw] * c + ifo[:, :hw] * g_g
        h_new = ifo[:, 2 * hw:] * jnp.tanh(c_new)
        return h_new, c_new

    zero_w = jnp.zeros((rows_w, hw), jnp.float32)
    h_last, _ = lax.fori_loop(0, char_len, word_step, (zero_w, zero_w),
                              unroll=_unroll(char_len))

    # word_representation = concat(forward_hidden, backward_hidden), kept in vregs.
    word_reps = jnp.concatenate(
        [h_last[:num_words], h_last[num_words:2 * num_words]], axis=1)      # (W, 2Hw)

    # ---------------- SpanRepresentation ----------------
    t_pad = gins_ref.shape[0]
    two_hw = 2 * hw
    padded = jnp.concatenate(
        [jnp.zeros((1, two_hw), jnp.float32),
         word_reps,
         jnp.zeros((t_pad - num_words - 1, two_hw), jnp.float32)], axis=0)  # (t_pad, 2Hw)

    # Hoisted span-LSTM input projection for BOTH directions (gate blocks side by side).
    gins_ref[...] = (
        jnp.dot(padded.astype(jnp.bfloat16), wihs_ref[...],
                preferred_element_type=jnp.float32)
        + bs_ref[...]
    )

    # Rows beyond t_span are read by the selection matmuls (with zero weight); they must
    # be finite, so zero-init the slab instead of leaving stale VMEM.
    hseq_ref[...] = jnp.zeros_like(hseq_ref)
    whh_s = whhs_ref[...]

    def span_step(t, carry):
        h, c = carry                                                        # (rows_s, Hs)
        hh = jnp.dot(h.astype(jnp.bfloat16), whh_s,
                     preferred_element_type=jnp.float32)                    # (rows_s, 8Hs)
        gin_f = gins_ref[pl.ds(t, 1), :gs]                 # forward dir reads padded[t]
        gin_r = gins_ref[pl.ds(t_span - 1 - t, 1), gs:]    # reverse dir reads padded[T-1-t]
        gates = jnp.concatenate(
            [hh[0:1, :gs] + gin_f,
             hh[1:2, gs:] + gin_r,
             jnp.zeros((rows_s - 2, gs), jnp.float32)], axis=0)             # (rows_s, 4Hs)
        ifo = jax.nn.sigmoid(gates[:, :3 * hs])
        g_g = jnp.tanh(gates[:, 3 * hs:])
        c_new = ifo[:, hs:2 * hs] * c + ifo[:, :hs] * g_g
        h_new = ifo[:, 2 * hs:] * jnp.tanh(c_new)
        # Step-major slab: row block t holds [fwd_dir(t); rev_stream(step t); pad rows].
        hseq_ref[pl.ds(pl.multiple_of(t * rows_s, 8), rows_s), :] = h_new
        return h_new, c_new

    zero_s = jnp.zeros((rows_s, hs), jnp.float32)
    _ = lax.fori_loop(0, t_span, span_step, (zero_s, zero_s), unroll=_unroll(t_span))

    # Span "gather" as +/-1 selection-matrix matmuls against the VMEM-resident slab.
    hseq = hseq_ref[...]                                                    # (t_pad*8, Hs)
    fwd_diff = jnp.dot(sf_ref[...], hseq, preferred_element_type=jnp.float32)
    bwd_diff = jnp.dot(sb_ref[...], hseq, preferred_element_type=jnp.float32)

    n_pad = fwd_diff.shape[0]
    d_in_pad = w1_ref.shape[0]
    pieces = [fwd_diff, bwd_diff]
    if d_in_pad > 2 * hs:
        pieces.append(jnp.zeros((n_pad, d_in_pad - 2 * hs), jnp.float32))
    span_reps = jnp.concatenate(pieces, axis=1)                 # (n_pad, 128) lane-dense

    # ---------------- SpanClassification ----------------
    h1 = jnp.dot(span_reps.astype(jnp.bfloat16), w1_ref[...],
                 preferred_element_type=jnp.float32) + b1_ref[...]
    h1 = jnp.maximum(h1, 0.0)
    scores = jnp.dot(h1.astype(jnp.bfloat16), w2_ref[...],
                     preferred_element_type=jnp.float32) + b2_ref[...]
    col = lax.broadcasted_iota(jnp.int32, scores.shape, 1)
    out_ref[...] = jnp.where(col == 0, 0.0, scores)             # scores[:, 0] = 0


_VMEM = pl.BlockSpec(memory_space=pltpu.MemorySpace.VMEM)


# ---------------------------------------------------------------------------
# Parameter init (PyTorch-like raw layout) and kernel-layout prep
# ---------------------------------------------------------------------------

def _uniform(key, shape, bound=0.1):
    return jax.random.uniform(key, shape, jnp.float32, -bound, bound)


def init_lstm_params(key, input_dim, hidden):
    k1, k2, k3, k4 = jax.random.split(key, 4)
    return {"w_ih": _uniform(k1, (4 * hidden, input_dim)),   # PyTorch layout, gates (i,f,g,o)
            "w_hh": _uniform(k2, (4 * hidden, hidden)),
            "b_ih": _uniform(k3, (4 * hidden,)),
            "b_hh": _uniform(k4, (4 * hidden,))}


def _gate_reorder_idx(hidden):
    # PyTorch gate packing (i, f, g, o) -> kernel packing (i, f, o, g).
    return jnp.concatenate([jnp.arange(0, 2 * hidden),
                            jnp.arange(3 * hidden, 4 * hidden),
                            jnp.arange(2 * hidden, 3 * hidden)])


def _prep_direction(raw, hidden):
    idx = _gate_reorder_idx(hidden)
    return raw["w_ih"][idx].T, raw["w_hh"][idx].T, (raw["b_ih"] + raw["b_hh"])[idx]


def prep_lstm_pair(raw_a, raw_b, hidden):
    wa, ha, ba = _prep_direction(raw_a, hidden)
    wb, hb, bb = _prep_direction(raw_b, hidden)
    return {"wih": jnp.concatenate([wa, wb], axis=1).astype(jnp.bfloat16),  # (D, 8H)
            "whh": jnp.concatenate([ha, hb], axis=1).astype(jnp.bfloat16),  # (H, 8H)
            "b": jnp.concatenate([ba, bb])[None, :].astype(jnp.float32)}    # (1, 8H)


def init_parser_params(key, num_symbols, embedding_dim, word_hidden, span_hidden,
                       ff_hidden, num_labels):
    keys = jax.random.split(key, 9)
    return {"embedding": _uniform(keys[0], (num_symbols, embedding_dim), 1.0),
            "word_fwd": init_lstm_params(keys[1], embedding_dim, word_hidden),
            "word_bwd": init_lstm_params(keys[2], embedding_dim, word_hidden),
            "span_fwd": init_lstm_params(keys[3], 2 * word_hidden, span_hidden),
            "span_rev": init_lstm_params(keys[4], 2 * word_hidden, span_hidden),
            "ff_w1": _uniform(keys[5], (ff_hidden, 2 * span_hidden)),
            "ff_b1": _uniform(keys[6], (ff_hidden,)),
            "ff_w2": _uniform(keys[7], (num_labels, ff_hidden)),
            "ff_b2": _uniform(keys[8], (num_labels,))}


def prep_parser_params(raw, word_hidden, span_hidden, ff_hidden, num_labels):
    d_in = 2 * span_hidden
    d_in_pad = _round_up(d_in, LANE)
    ff_pad = _round_up(ff_hidden, LANE)
    label_pad = _round_up(num_labels, LANE)
    w1_t = jnp.zeros((d_in_pad, ff_pad), jnp.float32).at[:d_in, :ff_hidden].set(raw["ff_w1"].T)
    b1 = jnp.zeros((1, ff_pad), jnp.float32).at[0, :ff_hidden].set(raw["ff_b1"])
    w2_t = jnp.zeros((ff_pad, label_pad), jnp.float32).at[:ff_hidden, :num_labels].set(raw["ff_w2"].T)
    b2 = jnp.zeros((1, label_pad), jnp.float32).at[0, :num_labels].set(raw["ff_b2"])
    return {"embedding": raw["embedding"],
            "word": prep_lstm_pair(raw["word_fwd"], raw["word_bwd"], word_hidden),
            "span": prep_lstm_pair(raw["span_fwd"], raw["span_rev"], span_hidden),
            "ff_w1": w1_t.astype(jnp.bfloat16),        # (d_in_pad, ff_pad)
            "ff_b1": b1,                               # (1, ff_pad)
            "ff_w2": w2_t.astype(jnp.bfloat16),        # (ff_pad, label_pad)
            "ff_b2": b2}                               # (1, label_pad)


# ---------------------------------------------------------------------------
# Forward pass (mirrors Parser.forward; dropouts are eval-mode identities)
# ---------------------------------------------------------------------------

def parser_forward(params, suffix_tensor, prefix_tensor, num_labels):
    emb = params["embedding"]
    suffix_embedded = emb[suffix_tensor]      # (W, C, E)
    prefix_embedded = emb[prefix_tensor]      # (W, C, E)
    num_words, char_len, e_dim = suffix_embedded.shape

    # Time-major; all 2W char streams batched along sublanes: rows = [suffix | prefix | pad].
    x_word = jnp.concatenate(
        [jnp.transpose(suffix_embedded, (1, 0, 2)),
         jnp.transpose(prefix_embedded, (1, 0, 2))], axis=1)                # (C, 2W, E)
    rows_w = _round_up(2 * num_words, 16)     # 16: keep bf16 gin scratch slices tile-aligned
    x_word = jnp.pad(x_word, ((0, 0), (0, rows_w - 2 * num_words), (0, 0)))
    x_word_flat = x_word.reshape(char_len * rows_w, e_dim).astype(jnp.bfloat16)

    t_span = num_words + 2
    t_pad = _round_up(t_span, 8)
    rows_s = 8

    # +/-1 selection matrices implementing the span gather as matmuls against the
    # step-major (t_pad*rows_s, Hs) LSTM-output slab (row 0 of block t = forward dir at
    # time t, row 1 = reverse dir at step t, i.e. original time T-1-t).
    starts, ends = jnp.triu_indices(num_words + 1, k=1)   # == torch.combinations order
    n_spans = int(starts.shape[0])
    n_span_pad = _round_up(n_spans, 8)
    k_sel = t_pad * rows_s
    sf = (jax.nn.one_hot(ends * rows_s, k_sel, dtype=jnp.float32)
          - jax.nn.one_hot(starts * rows_s, k_sel, dtype=jnp.float32))
    sb = (jax.nn.one_hot((t_span - 2 - starts) * rows_s + 1, k_sel, dtype=jnp.float32)
          - jax.nn.one_hot((t_span - 2 - ends) * rows_s + 1, k_sel, dtype=jnp.float32))
    sf = jnp.pad(sf, ((0, n_span_pad - n_spans), (0, 0)))
    sb = jnp.pad(sb, ((0, n_span_pad - n_spans), (0, 0)))

    wk, sk = params["word"], params["span"]
    hw = wk["whh"].shape[0]
    hs = sk["whh"].shape[0]
    d_in_pad, ff_pad = params["ff_w1"].shape
    label_pad = params["ff_w2"].shape[1]

    args = (x_word_flat, wk["wih"], wk["whh"], wk["b"],
            sk["wih"], sk["whh"], sk["b"],
            sf, sb,
            params["ff_w1"], params["ff_b1"], params["ff_w2"], params["ff_b2"])

    flops = 2 * (char_len * rows_w * (e_dim + hw) * 8 * hw
                 + t_pad * 2 * hw * 8 * hs
                 + t_span * rows_s * hs * 8 * hs
                 + 2 * n_span_pad * k_sel * hs
                 + n_span_pad * ff_pad * (d_in_pad + label_pad))
    transcendentals = char_len * rows_w * 5 * hw + t_span * rows_s * 5 * hs
    bytes_accessed = sum(int(a.size) * a.dtype.itemsize for a in args) \
        + n_span_pad * label_pad * 4

    kernel = functools.partial(parser_fused_kernel,
                               char_len=char_len, rows_w=rows_w, num_words=num_words,
                               t_span=t_span, hw=hw, hs=hs)

    scores = pl.pallas_call(
        kernel,
        out_shape=jax.ShapeDtypeStruct((n_span_pad, label_pad), jnp.float32),
        in_specs=[_VMEM] * len(args),
        out_specs=_VMEM,
        scratch_shapes=[
            pltpu.VMEM((char_len * rows_w, 8 * hw), jnp.bfloat16),  # hoisted word gin (bf16)
            pltpu.VMEM((t_pad, 8 * hs), jnp.float32),               # hoisted span gin
            pltpu.VMEM((t_pad * rows_s, hs), jnp.float32),          # span LSTM output slab
        ],
        compiler_params=pltpu.CompilerParams(
            # Explicit limit: above v5e's 16 MiB scoped default, within v7x's 64 MiB physical.
            vmem_limit_bytes=32 * 1024 * 1024),
        cost_estimate=pl.CostEstimate(flops=int(flops),
                                      transcendentals=int(transcendentals),
                                      bytes_accessed=int(bytes_accessed)),
    )(*args)

    return scores[:n_spans, :num_labels]


# ---------------------------------------------------------------------------

if __name__ == "__main__":
    num_symbols = 50
    embedding_dim = 16
    word_hidden_size = 32
    span_hidden_size = 32
    ff_hidden_dim = 32
    num_labels = 8
    seq_len = 6        # number of words
    char_len = 5       # suffix / prefix length per word

    key = jax.random.PRNGKey(0)
    k_params, k_suf, k_pre = jax.random.split(key, 3)

    raw_params = init_parser_params(k_params, num_symbols, embedding_dim,
                                    word_hidden_size, span_hidden_size,
                                    ff_hidden_dim, num_labels)
    params = prep_parser_params(raw_params, word_hidden_size, span_hidden_size,
                                ff_hidden_dim, num_labels)

    suffix_tensor = jax.random.randint(k_suf, (seq_len, char_len), 0, num_symbols)
    prefix_tensor = jax.random.randint(k_pre, (seq_len, char_len), 0, num_symbols)

    fwd = jax.jit(functools.partial(parser_forward, num_labels=num_labels))
    scores = jax.block_until_ready(fwd(params, suffix_tensor, prefix_tensor))

    expected_spans = (seq_len + 1) * seq_len // 2
    assert scores.shape == (expected_spans, num_labels), scores.shape
    assert bool(jnp.all(scores[:, 0] == 0.0))
    assert bool(jnp.all(jnp.isfinite(scores)))
    print("KERNEL_OK")
</pallas_src>

<mosaic_0001>
module attributes {stable_mosaic.version = 11 : i64} {
  func.func @parser_fused_kernel(%arg0: memref<80x16xbf16, #tpu.memory_space<vmem>>, %arg1: memref<16x256xbf16, #tpu.memory_space<vmem>>, %arg2: memref<32x256xbf16, #tpu.memory_space<vmem>>, %arg3: memref<1x256xf32, #tpu.memory_space<vmem>>, %arg4: memref<64x256xbf16, #tpu.memory_space<vmem>>, %arg5: memref<32x256xbf16, #tpu.memory_space<vmem>>, %arg6: memref<1x256xf32, #tpu.memory_space<vmem>>, %arg7: memref<24x64xf32, #tpu.memory_space<vmem>>, %arg8: memref<24x64xf32, #tpu.memory_space<vmem>>, %arg9: memref<128x128xbf16, #tpu.memory_space<vmem>>, %arg10: memref<1x128xf32, #tpu.memory_space<vmem>>, %arg11: memref<128x128xbf16, #tpu.memory_space<vmem>>, %arg12: memref<1x128xf32, #tpu.memory_space<vmem>>, %arg13: memref<24x128xf32, #tpu.memory_space<vmem>>, %arg14: memref<80x256xbf16, #tpu.memory_space<vmem>>, %arg15: memref<8x256xf32, #tpu.memory_space<vmem>>, %arg16: memref<64x32xf32, #tpu.memory_space<vmem>>) attributes {dimension_semantics = [], scalar_prefetch = 0 : i64, scratch_operands = 3 : i64, tpu.core_type = #tpu.core_type<tc>} {
    %c0 = arith.constant 0 : index
    %c0_0 = arith.constant 0 : index
    %0 = vector.load %arg0[%c0, %c0_0] : memref<80x16xbf16, #tpu.memory_space<vmem>>, vector<80x16xbf16>
    %c0_1 = arith.constant 0 : index
    %c0_2 = arith.constant 0 : index
    %1 = vector.load %arg1[%c0_1, %c0_2] : memref<16x256xbf16, #tpu.memory_space<vmem>>, vector<16x256xbf16>
    %cst = arith.constant dense<0.000000e+00> : vector<80x256xf32>
    %2 = tpu.matmul %0, %1, %cst {dimension_numbers = #tpu.dot_dimension_numbers<[1], [0], [0], [1], [0, 0, 1, 1], [], []>} : vector<80x16xbf16>, vector<16x256xbf16>, vector<80x256xf32> -> vector<80x256xf32>
    %c0_3 = arith.constant 0 : index
    %c0_4 = arith.constant 0 : index
    %3 = vector.load %arg3[%c0_3, %c0_4] : memref<1x256xf32, #tpu.memory_space<vmem>>, vector<1x256xf32>
    %4 = vector.broadcast %3 : vector<1x256xf32> to vector<80x256xf32>
    %5 = arith.addf %2, %4 : vector<80x256xf32>
    %6 = arith.truncf %5 : vector<80x256xf32> to vector<80x256xbf16>
    %c0_5 = arith.constant 0 : index
    %c0_6 = arith.constant 0 : index
    %7 = vector.load %arg14[%c0_5, %c0_6] : memref<80x256xbf16, #tpu.memory_space<vmem>>, vector<80x256xbf16>
    tpu.vector_store %arg14[%c0_5, %c0_6], %6 {strides = array<i32>} : memref<80x256xbf16, #tpu.memory_space<vmem>>, vector<80x256xbf16>,
    %c0_7 = arith.constant 0 : index
    %c0_8 = arith.constant 0 : index
    %8 = vector.load %arg2[%c0_7, %c0_8] : memref<32x256xbf16, #tpu.memory_space<vmem>>, vector<32x256xbf16>
    %9 = tpu.iota {dimensions = array<i32: 0>} : vector<16x128xi32>
    %c6_i32 = arith.constant 6 : i32
    %10 = vector.broadcast %c6_i32 : i32 to vector<16x128xi32>
    %11 = arith.cmpi slt, %9, %10 : vector<16x128xi32>
    %cst_9 = arith.constant 0.000000e+00 : f32
    %12 = vector.broadcast %cst_9 : f32 to vector<16x32xf32>
    %c0_i32 = arith.constant 0 : i32
    %13 = arith.truncf %12 : vector<16x32xf32> to vector<16x32xbf16>
    %cst_10 = arith.constant dense<0.000000e+00> : vector<16x256xf32>
    %14 = tpu.matmul %13, %8, %cst_10 {dimension_numbers = #tpu.dot_dimension_numbers<[1], [0], [0], [1], [0, 0, 1, 1], [], []>} : vector<16x32xbf16>, vector<32x256xbf16>, vector<16x256xf32> -> vector<16x256xf32>
    %c16_i32 = arith.constant 16 : i32
    %15 = arith.muli %c0_i32, %c16_i32 : i32
    %16 = tpu.assume_multiple %15, 16 : i32
    %17 = arith.index_cast %16 : i32 to index
    %c0_11 = arith.constant 0 : index
    %18 = vector.load %arg14[%17, %c0_11] : memref<80x256xbf16, #tpu.memory_space<vmem>>, vector<16x256xbf16>
    %19 = arith.extf %18 : vector<16x256xbf16> to vector<16x256xf32>
    %20 = arith.addf %19, %14 : vector<16x256xf32>
    %21 = vector.extract_strided_slice %20 {offsets = [0, 0], sizes = [16, 128], strides = [1, 1]} : vector<16x256xf32> to vector<16x128xf32>
    %22 = vector.extract_strided_slice %20 {offsets = [0, 128], sizes = [16, 128], strides = [1, 1]} : vector<16x256xf32> to vector<16x128xf32>
    %23 = arith.select %11, %21, %22 : vector<16x128xi1>, vector<16x128xf32>
    %24 = vector.extract_strided_slice %23 {offsets = [0, 0], sizes = [16, 96], strides = [1, 1]} : vector<16x128xf32> to vector<16x96xf32>
    %25 = arith.negf %24 : vector<16x96xf32>
    %26 = math.exp %25 : vector<16x96xf32>
    %cst_12 = arith.constant 1.000000e+00 : f32
    %27 = vector.broadcast %cst_12 : f32 to vector<16x96xf32>
    %28 = arith.addf %27, %26 : vector<16x96xf32>
    %29 = arith.divf %27, %28 : vector<16x96xf32>
    %30 = vector.extract_strided_slice %23 {offsets = [0, 96], sizes = [16, 32], strides = [1, 1]} : vector<16x128xf32> to vector<16x32xf32>
    %31 = math.tanh %30 : vector<16x32xf32>
    %32 = vector.extract_strided_slice %29 {offsets = [0, 32], sizes = [16, 32], strides = [1, 1]} : vector<16x96xf32> to vector<16x32xf32>
    %33 = arith.mulf %32, %12 : vector<16x32xf32>
    %34 = vector.extract_strided_slice %29 {offsets = [0, 0], sizes = [16, 32], strides = [1, 1]} : vector<16x96xf32> to vector<16x32xf32>
    %35 = arith.mulf %34, %31 : vector<16x32xf32>
    %36 = arith.addf %33, %35 : vector<16x32xf32>
    %37 = vector.extract_strided_slice %29 {offsets = [0, 64], sizes = [16, 32], strides = [1, 1]} : vector<16x96xf32> to vector<16x32xf32>
    %38 = math.tanh %36 : vector<16x32xf32>
    %39 = arith.mulf %37, %38 : vector<16x32xf32>
    %c1_i32 = arith.constant 1 : i32
    %40 = arith.truncf %39 : vector<16x32xf32> to vector<16x32xbf16>
    %cst_13 = arith.constant dense<0.000000e+00> : vector<16x256xf32>
    %41 = tpu.matmul %40, %8, %cst_13 {dimension_numbers = #tpu.dot_dimension_numbers<[1], [0], [0], [1], [0, 0, 1, 1], [], []>} : vector<16x32xbf16>, vector<32x256xbf16>, vector<16x256xf32> -> vector<16x256xf32>
    %c16_i32_14 = arith.constant 16 : i32
    %42 = arith.muli %c1_i32, %c16_i32_14 : i32
    %43 = tpu.assume_multiple %42, 16 : i32
    %44 = arith.index_cast %43 : i32 to index
    %c0_15 = arith.constant 0 : index
    %45 = vector.load %arg14[%44, %c0_15] : memref<80x256xbf16, #tpu.memory_space<vmem>>, vector<16x256xbf16>
    %46 = arith.extf %45 : vector<16x256xbf16> to vector<16x256xf32>
    %47 = arith.addf %46, %41 : vector<16x256xf32>
    %48 = vector.extract_strided_slice %47 {offsets = [0, 0], sizes = [16, 128], strides = [1, 1]} : vector<16x256xf32> to vector<16x128xf32>
    %49 = vector.extract_strided_slice %47 {offsets = [0, 128], sizes = [16, 128], strides = [1, 1]} : vector<16x256xf32> to vector<16x128xf32>
    %50 = arith.select %11, %48, %49 : vector<16x128xi1>, vector<16x128xf32>
    %51 = vector.extract_strided_slice %50 {offsets = [0, 0], sizes = [16, 96], strides = [1, 1]} : vector<16x128xf32> to vector<16x96xf32>
    %52 = arith.negf %51 : vector<16x96xf32>
    %53 = math.exp %52 : vector<16x96xf32>
    %cst_16 = arith.constant 1.000000e+00 : f32
    %54 = vector.broadcast %cst_16 : f32 to vector<16x96xf32>
    %55 = arith.addf %54, %53 : vector<16x96xf32>
    %56 = arith.divf %54, %55 : vector<16x96xf32>
    %57 = vector.extract_strided_slice %50 {offsets = [0, 96], sizes = [16, 32], strides = [1, 1]} : vector<16x128xf32> to vector<16x32xf32>
    %58 = math.tanh %57 : vector<16x32xf32>
    %59 = vector.extract_strided_slice %56 {offsets = [0, 32], sizes = [16, 32], strides = [1, 1]} : vector<16x96xf32> to vector<16x32xf32>
    %60 = arith.mulf %59, %36 : vector<16x32xf32>
    %61 = vector.extract_strided_slice %56 {offsets = [0, 0], sizes = [16, 32], strides = [1, 1]} : vector<16x96xf32> to vector<16x32xf32>
    %62 = arith.mulf %61, %58 : vector<16x32xf32>
    %63 = arith.addf %60, %62 : vector<16x32xf32>
    %64 = vector.extract_strided_slice %56 {offsets = [0, 64], sizes = [16, 32], strides = [1, 1]} : vector<16x96xf32> to vector<16x32xf32>
    %65 = math.tanh %63 : vector<16x32xf32>
    %66 = arith.mulf %64, %65 : vector<16x32xf32>
    %c2_i32 = arith.constant 2 : i32
    %67 = arith.truncf %66 : vector<16x32xf32> to vector<16x32xbf16>
    %cst_17 = arith.constant dense<0.000000e+00> : vector<16x256xf32>
    %68 = tpu.matmul %67, %8, %cst_17 {dimension_numbers = #tpu.dot_dimension_numbers<[1], [0], [0], [1], [0, 0, 1, 1], [], []>} : vector<16x32xbf16>, vector<32x256xbf16>, vector<16x256xf32> -> vector<16x256xf32>
    %c16_i32_18 = arith.constant 16 : i32
    %69 = arith.muli %c2_i32, %c16_i32_18 : i32
    %70 = tpu.assume_multiple %69, 16 : i32
    %71 = arith.index_cast %70 : i32 to index
    %c0_19 = arith.constant 0 : index
    %72 = vector.load %arg14[%71, %c0_19] : memref<80x256xbf16, #tpu.memory_space<vmem>>, vector<16x256xbf16>
    %73 = arith.extf %72 : vector<16x256xbf16> to vector<16x256xf32>
    %74 = arith.addf %73, %68 : vector<16x256xf32>
    %75 = vector.extract_strided_slice %74 {offsets = [0, 0], sizes = [16, 128], strides = [1, 1]} : vector<16x256xf32> to vector<16x128xf32>
    %76 = vector.extract_strided_slice %74 {offsets = [0, 128], sizes = [16, 128], strides = [1, 1]} : vector<16x256xf32> to vector<16x128xf32>
    %77 = arith.select %11, %75, %76 : vector<16x128xi1>, vector<16x128xf32>
    %78 = vector.extract_strided_slice %77 {offsets = [0, 0], sizes = [16, 96], strides = [1, 1]} : vector<16x128xf32> to vector<16x96xf32>
    %79 = arith.negf %78 : vector<16x96xf32>
    %80 = math.exp %79 : vector<16x96xf32>
    %cst_20 = arith.constant 1.000000e+00 : f32
    %81 = vector.broadcast %cst_20 : f32 to vector<16x96xf32>
    %82 = arith.addf %81, %80 : vector<16x96xf32>
    %83 = arith.divf %81, %82 : vector<16x96xf32>
    %84 = vector.extract_strided_slice %77 {offsets = [0, 96], sizes = [16, 32], strides = [1, 1]} : vector<16x128xf32> to vector<16x32xf32>
    %85 = math.tanh %84 : vector<16x32xf32>
    %86 = vector.extract_strided_slice %83 {offsets = [0, 32], sizes = [16, 32], strides = [1, 1]} : vector<16x96xf32> to vector<16x32xf32>
    %87 = arith.mulf %86, %63 : vector<16x32xf32>
    %88 = vector.extract_strided_slice %83 {offsets = [0, 0], sizes = [16, 32], strides = [1, 1]} : vector<16x96xf32> to vector<16x32xf32>
    %89 = arith.mulf %88, %85 : vector<16x32xf32>
    %90 = arith.addf %87, %89 : vector<16x32xf32>
    %91 = vector.extract_strided_slice %83 {offsets = [0, 64], sizes = [16, 32], strides = [1, 1]} : vector<16x96xf32> to vector<16x32xf32>
    %92 = math.tanh %90 : vector<16x32xf32>
    %93 = arith.mulf %91, %92 : vector<16x32xf32>
    %c3_i32 = arith.constant 3 : i32
    %94 = arith.truncf %93 : vector<16x32xf32> to vector<16x32xbf16>
    %cst_21 = arith.constant dense<0.000000e+00> : vector<16x256xf32>
    %95 = tpu.matmul %94, %8, %cst_21 {dimension_numbers = #tpu.dot_dimension_numbers<[1], [0], [0], [1], [0, 0, 1, 1], [], []>} : vector<16x32xbf16>, vector<32x256xbf16>, vector<16x256xf32> -> vector<16x256xf32>
    %c16_i32_22 = arith.constant 16 : i32
    %96 = arith.muli %c3_i32, %c16_i32_22 : i32
    %97 = tpu.assume_multiple %96, 16 : i32
    %98 = arith.index_cast %97 : i32 to index
    %c0_23 = arith.constant 0 : index
    %99 = vector.load %arg14[%98, %c0_23] : memref<80x256xbf16, #tpu.memory_space<vmem>>, vector<16x256xbf16>
    %100 = arith.extf %99 : vector<16x256xbf16> to vector<16x256xf32>
    %101 = arith.addf %100, %95 : vector<16x256xf32>
    %102 = vector.extract_strided_slice %101 {offsets = [0, 0], sizes = [16, 128], strides = [1, 1]} : vector<16x256xf32> to vector<16x128xf32>
    %103 = vector.extract_strided_slice %101 {offsets = [0, 128], sizes = [16, 128], strides = [1, 1]} : vector<16x256xf32> to vector<16x128xf32>
    %104 = arith.select %11, %102, %103 : vector<16x128xi1>, vector<16x128xf32>
    %105 = vector.extract_strided_slice %104 {offsets = [0, 0], sizes = [16, 96], strides = [1, 1]} : vector<16x128xf32> to vector<16x96xf32>
    %106 = arith.negf %105 : vector<16x96xf32>
    %107 = math.exp %106 : vector<16x96xf32>
    %cst_24 = arith.constant 1.000000e+00 : f32
    %108 = vector.broadcast %cst_24 : f32 to vector<16x96xf32>
    %109 = arith.addf %108, %107 : vector<16x96xf32>
    %110 = arith.divf %108, %109 : vector<16x96xf32>
    %111 = vector.extract_strided_slice %104 {offsets = [0, 96], sizes = [16, 32], strides = [1, 1]} : vector<16x128xf32> to vector<16x32xf32>
    %112 = math.tanh %111 : vector<16x32xf32>
    %113 = vector.extract_strided_slice %110 {offsets = [0, 32], sizes = [16, 32], strides = [1, 1]} : vector<16x96xf32> to vector<16x32xf32>
    %114 = arith.mulf %113, %90 : vector<16x32xf32>
    %115 = vector.extract_strided_slice %110 {offsets = [0, 0], sizes = [16, 32], strides = [1, 1]} : vector<16x96xf32> to vector<16x32xf32>
    %116 = arith.mulf %115, %112 : vector<16x32xf32>
    %117 = arith.addf %114, %116 : vector<16x32xf32>
    %118 = vector.extract_strided_slice %110 {offsets = [0, 64], sizes = [16, 32], strides = [1, 1]} : vector<16x96xf32> to vector<16x32xf32>
    %119 = math.tanh %117 : vector<16x32xf32>
    %120 = arith.mulf %118, %119 : vector<16x32xf32>
    %c4_i32 = arith.constant 4 : i32
    %121 = arith.truncf %120 : vector<16x32xf32> to vector<16x32xbf16>
    %cst_25 = arith.constant dense<0.000000e+00> : vector<16x256xf32>
    %122 = tpu.matmul %121, %8, %cst_25 {dimension_numbers = #tpu.dot_dimension_numbers<[1], [0], [0], [1], [0, 0, 1, 1], [], []>} : vector<16x32xbf16>, vector<32x256xbf16>, vector<16x256xf32> -> vector<16x256xf32>
    %c16_i32_26 = arith.constant 16 : i32
    %123 = arith.muli %c4_i32, %c16_i32_26 : i32
    %124 = tpu.assume_multiple %123, 16 : i32
    %125 = arith.index_cast %124 : i32 to index
    %c0_27 = arith.constant 0 : index
    %126 = vector.load %arg14[%125, %c0_27] : memref<80x256xbf16, #tpu.memory_space<vmem>>, vector<16x256xbf16>
    %127 = arith.extf %126 : vector<16x256xbf16> to vector<16x256xf32>
    %128 = arith.addf %127, %122 : vector<16x256xf32>
    %129 = vector.extract_strided_slice %128 {offsets = [0, 0], sizes = [16, 128], strides = [1, 1]} : vector<16x256xf32> to vector<16x128xf32>
    %130 = vector.extract_strided_slice %128 {offsets = [0, 128], sizes = [16, 128], strides = [1, 1]} : vector<16x256xf32> to vector<16x128xf32>
    %131 = arith.select %11, %129, %130 : vector<16x128xi1>, vector<16x128xf32>
    %132 = vector.extract_strided_slice %131 {offsets = [0, 0], sizes = [16, 96], strides = [1, 1]} : vector<16x128xf32> to vector<16x96xf32>
    %133 = arith.negf %132 : vector<16x96xf32>
    %134 = math.exp %133 : vector<16x96xf32>
    %cst_28 = arith.constant 1.000000e+00 : f32
    %135 = vector.broadcast %cst_28 : f32 to vector<16x96xf32>
    %136 = arith.addf %135, %134 : vector<16x96xf32>
    %137 = arith.divf %135, %136 : vector<16x96xf32>
    %138 = vector.extract_strided_slice %131 {offsets = [0, 96], sizes = [16, 32], strides = [1, 1]} : vector<16x128xf32> to vector<16x32xf32>
    %139 = math.tanh %138 : vector<16x32xf32>
    %140 = vector.extract_strided_slice %137 {offsets = [0, 32], sizes = [16, 32], strides = [1, 1]} : vector<16x96xf32> to vector<16x32xf32>
    %141 = arith.mulf %140, %117 : vector<16x32xf32>
    %142 = vector.extract_strided_slice %137 {offsets = [0, 0], sizes = [16, 32], strides = [1, 1]} : vector<16x96xf32> to vector<16x32xf32>
    %143 = arith.mulf %142, %139 : vector<16x32xf32>
    %144 = arith.addf %141, %143 : vector<16x32xf32>
    %145 = vector.extract_strided_slice %137 {offsets = [0, 64], sizes = [16, 32], strides = [1, 1]} : vector<16x96xf32> to vector<16x32xf32>
    %146 = math.tanh %144 : vector<16x32xf32>
    %147 = arith.mulf %145, %146 : vector<16x32xf32>
    %c5_i32 = arith.constant 5 : i32
    %148 = vector.extract_strided_slice %147 {offsets = [0, 0], sizes = [6, 32], strides = [1, 1]} : vector<16x32xf32> to vector<6x32xf32>
    %149 = vector.extract_strided_slice %147 {offsets = [6, 0], sizes = [6, 32], strides = [1, 1]} : vector<16x32xf32> to vector<6x32xf32>
    %150 = tpu.concatenate %148, %149 in 1 : vector<6x32xf32>, vector<6x32xf32> -> vector<6x64xf32>
    %cst_29 = arith.constant 0.000000e+00 : f32
    %151 = vector.broadcast %cst_29 : f32 to vector<1x64xf32>
    %cst_30 = arith.constant 0.000000e+00 : f32
    %152 = vector.broadcast %cst_30 : f32 to vector<1x64xf32>
    %153 = tpu.concatenate %151, %150, %152 in 0 : vector<1x64xf32>, vector<6x64xf32>, vector<1x64xf32> -> vector<8x64xf32>
    %154 = arith.truncf %153 : vector<8x64xf32> to vector<8x64xbf16>
    %c0_31 = arith.constant 0 : index
    %c0_32 = arith.constant 0 : index
    %155 = vector.load %arg4[%c0_31, %c0_32] : memref<64x256xbf16, #tpu.memory_space<vmem>>, vector<64x256xbf16>
    %cst_33 = arith.constant dense<0.000000e+00> : vector<8x256xf32>
    %156 = tpu.matmul %154, %155, %cst_33 {dimension_numbers = #tpu.dot_dimension_numbers<[1], [0], [0], [1], [0, 0, 1, 1], [], []>} : vector<8x64xbf16>, vector<64x256xbf16>, vector<8x256xf32> -> vector<8x256xf32>
    %c0_34 = arith.constant 0 : index
    %c0_35 = arith.constant 0 : index
    %157 = vector.load %arg6[%c0_34, %c0_35] : memref<1x256xf32, #tpu.memory_space<vmem>>, vector<1x256xf32>
    %158 = vector.broadcast %157 : vector<1x256xf32> to vector<8x256xf32>
    %159 = arith.addf %156, %158 : vector<8x256xf32>
    %c0_36 = arith.constant 0 : index
    %c0_37 = arith.constant 0 : index
    %160 = vector.load %arg15[%c0_36, %c0_37] : memref<8x256xf32, #tpu.memory_space<vmem>>, vector<8x256xf32>
    tpu.vector_store %arg15[%c0_36, %c0_37], %159 {strides = array<i32>} : memref<8x256xf32, #tpu.memory_space<vmem>>, vector<8x256xf32>,
    %cst_38 = arith.constant 0.000000e+00 : f32
    %161 = vector.broadcast %cst_38 : f32 to vector<64x32xf32>
    %c0_39 = arith.constant 0 : index
    %c0_40 = arith.constant 0 : index
    %162 = vector.load %arg16[%c0_39, %c0_40] : memref<64x32xf32, #tpu.memory_space<vmem>>, vector<64x32xf32>
    tpu.vector_store %arg16[%c0_39, %c0_40], %161 {strides = array<i32>} : memref<64x32xf32, #tpu.memory_space<vmem>>, vector<64x32xf32>,
    %c0_41 = arith.constant 0 : index
    %c0_42 = arith.constant 0 : index
    %163 = vector.load %arg5[%c0_41, %c0_42] : memref<32x256xbf16, #tpu.memory_space<vmem>>, vector<32x256xbf16>
    %cst_43 = arith.constant 0.000000e+00 : f32
    %164 = vector.broadcast %cst_43 : f32 to vector<8x32xf32>
    %c0_i32_44 = arith.constant 0 : i32
    %165 = arith.truncf %164 : vector<8x32xf32> to vector<8x32xbf16>
    %cst_45 = arith.constant dense<0.000000e+00> : vector<8x256xf32>
    %166 = tpu.matmul %165, %163, %cst_45 {dimension_numbers = #tpu.dot_dimension_numbers<[1], [0], [0], [1], [0, 0, 1, 1], [], []>} : vector<8x32xbf16>, vector<32x256xbf16>, vector<8x256xf32> -> vector<8x256xf32>
    %167 = arith.index_cast %c0_i32_44 : i32 to index
    %c0_46 = arith.constant 0 : index
    %168 = vector.load %arg15[%167, %c0_46] : memref<8x256xf32, #tpu.memory_space<vmem>>, vector<1x128xf32>
    %c7_i32 = arith.constant 7 : i32
    %169 = arith.subi %c7_i32, %c0_i32_44 : i32
    %170 = arith.index_cast %169 : i32 to index
    %c128 = arith.constant 128 : index
    %171 = vector.load %arg15[%170, %c128] : memref<8x256xf32, #tpu.memory_space<vmem>>, vector<1x128xf32>
    %172 = vector.extract_strided_slice %166 {offsets = [0, 0], sizes = [1, 128], strides = [1, 1]} : vector<8x256xf32> to vector<1x128xf32>
    %173 = arith.addf %172, %168 : vector<1x128xf32>
    %174 = vector.extract_strided_slice %166 {offsets = [1, 128], sizes = [1, 128], strides = [1, 1]} : vector<8x256xf32> to vector<1x128xf32>
    %175 = arith.addf %174, %171 : vector<1x128xf32>
    %cst_47 = arith.constant 0.000000e+00 : f32
    %176 = vector.broadcast %cst_47 : f32 to vector<6x128xf32>
    %177 = tpu.concatenate %173, %175, %176 in 0 : vector<1x128xf32>, vector<1x128xf32>, vector<6x128xf32> -> vector<8x128xf32>
    %178 = vector.extract_strided_slice %177 {offsets = [0, 0], sizes = [8, 96], strides = [1, 1]} : vector<8x128xf32> to vector<8x96xf32>
    %179 = arith.negf %178 : vector<8x96xf32>
    %180 = math.exp %179 : vector<8x96xf32>
    %cst_48 = arith.constant 1.000000e+00 : f32
    %181 = vector.broadcast %cst_48 : f32 to vector<8x96xf32>
    %182 = arith.addf %181, %180 : vector<8x96xf32>
    %183 = arith.divf %181, %182 : vector<8x96xf32>
    %184 = vector.extract_strided_slice %177 {offsets = [0, 96], sizes = [8, 32], strides = [1, 1]} : vector<8x128xf32> to vector<8x32xf32>
    %185 = math.tanh %184 : vector<8x32xf32>
    %186 = vector.extract_strided_slice %183 {offsets = [0, 32], sizes = [8, 32], strides = [1, 1]} : vector<8x96xf32> to vector<8x32xf32>
    %187 = arith.mulf %186, %164 : vector<8x32xf32>
    %188 = vector.extract_strided_slice %183 {offsets = [0, 0], sizes = [8, 32], strides = [1, 1]} : vector<8x96xf32> to vector<8x32xf32>
    %189 = arith.mulf %188, %185 : vector<8x32xf32>
    %190 = arith.addf %187, %189 : vector<8x32xf32>
    %191 = vector.extract_strided_slice %183 {offsets = [0, 64], sizes = [8, 32], strides = [1, 1]} : vector<8x96xf32> to vector<8x32xf32>
    %192 = math.tanh %190 : vector<8x32xf32>
    %193 = arith.mulf %191, %192 : vector<8x32xf32>
    %c8_i32 = arith.constant 8 : i32
    %194 = arith.muli %c0_i32_44, %c8_i32 : i32
    %195 = tpu.assume_multiple %194, 8 : i32
    %196 = arith.index_cast %195 : i32 to index
    %c0_49 = arith.constant 0 : index
    %197 = vector.load %arg16[%196, %c0_49] : memref<64x32xf32, #tpu.memory_space<vmem>>, vector<8x32xf32>
    tpu.vector_store %arg16[%196, %c0_49], %193 {strides = array<i32>} : memref<64x32xf32, #tpu.memory_space<vmem>>, vector<8x32xf32>,
    %c1_i32_50 = arith.constant 1 : i32
    %198 = arith.truncf %193 : vector<8x32xf32> to vector<8x32xbf16>
    %cst_51 = arith.constant dense<0.000000e+00> : vector<8x256xf32>
    %199 = tpu.matmul %198, %163, %cst_51 {dimension_numbers = #tpu.dot_dimension_numbers<[1], [0], [0], [1], [0, 0, 1, 1], [], []>} : vector<8x32xbf16>, vector<32x256xbf16>, vector<8x256xf32> -> vector<8x256xf32>
    %200 = arith.index_cast %c1_i32_50 : i32 to index
    %c0_52 = arith.constant 0 : index
    %201 = vector.load %arg15[%200, %c0_52] : memref<8x256xf32, #tpu.memory_space<vmem>>, vector<1x128xf32>
    %c7_i32_53 = arith.constant 7 : i32
    %202 = arith.subi %c7_i32_53, %c1_i32_50 : i32
    %203 = arith.index_cast %202 : i32 to index
    %c128_54 = arith.constant 128 : index
    %204 = vector.load %arg15[%203, %c128_54] : memref<8x256xf32, #tpu.memory_space<vmem>>, vector<1x128xf32>
    %205 = vector.extract_strided_slice %199 {offsets = [0, 0], sizes = [1, 128], strides = [1, 1]} : vector<8x256xf32> to vector<1x128xf32>
    %206 = arith.addf %205, %201 : vector<1x128xf32>
    %207 = vector.extract_strided_slice %199 {offsets = [1, 128], sizes = [1, 128], strides = [1, 1]} : vector<8x256xf32> to vector<1x128xf32>
    %208 = arith.addf %207, %204 : vector<1x128xf32>
    %cst_55 = arith.constant 0.000000e+00 : f32
    %209 = vector.broadcast %cst_55 : f32 to vector<6x128xf32>
    %210 = tpu.concatenate %206, %208, %209 in 0 : vector<1x128xf32>, vector<1x128xf32>, vector<6x128xf32> -> vector<8x128xf32>
    %211 = vector.extract_strided_slice %210 {offsets = [0, 0], sizes = [8, 96], strides = [1, 1]} : vector<8x128xf32> to vector<8x96xf32>
    %212 = arith.negf %211 : vector<8x96xf32>
    %213 = math.exp %212 : vector<8x96xf32>
    %cst_56 = arith.constant 1.000000e+00 : f32
    %214 = vector.broadcast %cst_56 : f32 to vector<8x96xf32>
    %215 = arith.addf %214, %213 : vector<8x96xf32>
    %216 = arith.divf %214, %215 : vector<8x96xf32>
    %217 = vector.extract_strided_slice %210 {offsets = [0, 96], sizes = [8, 32], strides = [1, 1]} : vector<8x128xf32> to vector<8x32xf32>
    %218 = math.tanh %217 : vector<8x32xf32>
    %219 = vector.extract_strided_slice %216 {offsets = [0, 32], sizes = [8, 32], strides = [1, 1]} : vector<8x96xf32> to vector<8x32xf32>
    %220 = arith.mulf %219, %190 : vector<8x32xf32>
    %221 = vector.extract_strided_slice %216 {offsets = [0, 0], sizes = [8, 32], strides = [1, 1]} : vector<8x96xf32> to vector<8x32xf32>
    %222 = arith.mulf %221, %218 : vector<8x32xf32>
    %223 = arith.addf %220, %222 : vector<8x32xf32>
    %224 = vector.extract_strided_slice %216 {offsets = [0, 64], sizes = [8, 32], strides = [1, 1]} : vector<8x96xf32> to vector<8x32xf32>
    %225 = math.tanh %223 : vector<8x32xf32>
    %226 = arith.mulf %224, %225 : vector<8x32xf32>
    %c8_i32_57 = arith.constant 8 : i32
    %227 = arith.muli %c1_i32_50, %c8_i32_57 : i32
    %228 = tpu.assume_multiple %227, 8 : i32
    %229 = arith.index_cast %228 : i32 to index
    %c0_58 = arith.constant 0 : index
    %230 = vector.load %arg16[%229, %c0_58] : memref<64x32xf32, #tpu.memory_space<vmem>>, vector<8x32xf32>
    tpu.vector_store %arg16[%229, %c0_58], %226 {strides = array<i32>} : memref<64x32xf32, #tpu.memory_space<vmem>>, vector<8x32xf32>,
    %c2_i32_59 = arith.constant 2 : i32
    %231 = arith.truncf %226 : vector<8x32xf32> to vector<8x32xbf16>
    %cst_60 = arith.constant dense<0.000000e+00> : vector<8x256xf32>
    %232 = tpu.matmul %231, %163, %cst_60 {dimension_numbers = #tpu.dot_dimension_numbers<[1], [0], [0], [1], [0, 0, 1, 1], [], []>} : vector<8x32xbf16>, vector<32x256xbf16>, vector<8x256xf32> -> vector<8x256xf32>
    %233 = arith.index_cast %c2_i32_59 : i32 to index
    %c0_61 = arith.constant 0 : index
    %234 = vector.load %arg15[%233, %c0_61] : memref<8x256xf32, #tpu.memory_space<vmem>>, vector<1x128xf32>
    %c7_i32_62 = arith.constant 7 : i32
    %235 = arith.subi %c7_i32_62, %c2_i32_59 : i32
    %236 = arith.index_cast %235 : i32 to index
    %c128_63 = arith.constant 128 : index
    %237 = vector.load %arg15[%236, %c128_63] : memref<8x256xf32, #tpu.memory_space<vmem>>, vector<1x128xf32>
    %238 = vector.extract_strided_slice %232 {offsets = [0, 0], sizes = [1, 128], strides = [1, 1]} : vector<8x256xf32> to vector<1x128xf32>
    %239 = arith.addf %238, %234 : vector<1x128xf32>
    %240 = vector.extract_strided_slice %232 {offsets = [1, 128], sizes = [1, 128], strides = [1, 1]} : vector<8x256xf32> to vector<1x128xf32>
    %241 = arith.addf %240, %237 : vector<1x128xf32>
    %cst_64 = arith.constant 0.000000e+00 : f32
    %242 = vector.broadcast %cst_64 : f32 to vector<6x128xf32>
    %243 = tpu.concatenate %239, %241, %242 in 0 : vector<1x128xf32>, vector<1x128xf32>, vector<6x128xf32> -> vector<8x128xf32>
    %244 = vector.extract_strided_slice %243 {offsets = [0, 0], sizes = [8, 96], strides = [1, 1]} : vector<8x128xf32> to vector<8x96xf32>
    %245 = arith.negf %244 : vector<8x96xf32>
    %246 = math.exp %245 : vector<8x96xf32>
    %cst_65 = arith.constant 1.000000e+00 : f32
    %247 = vector.broadcast %cst_65 : f32 to vector<8x96xf32>
    %248 = arith.addf %247, %246 : vector<8x96xf32>
    %249 = arith.divf %247, %248 : vector<8x96xf32>
    %250 = vector.extract_strided_slice %243 {offsets = [0, 96], sizes = [8, 32], strides = [1, 1]} : vector<8x128xf32> to vector<8x32xf32>
    %251 = math.tanh %250 : vector<8x32xf32>
    %252 = vector.extract_strided_slice %249 {offsets = [0, 32], sizes = [8, 32], strides = [1, 1]} : vector<8x96xf32> to vector<8x32xf32>
    %253 = arith.mulf %252, %223 : vector<8x32xf32>
    %254 = vector.extract_strided_slice %249 {offsets = [0, 0], sizes = [8, 32], strides = [1, 1]} : vector<8x96xf32> to vector<8x32xf32>
    %255 = arith.mulf %254, %251 : vector<8x32xf32>
    %256 = arith.addf %253, %255 : vector<8x32xf32>
    %257 = vector.extract_strided_slice %249 {offsets = [0, 64], sizes = [8, 32], strides = [1, 1]} : vector<8x96xf32> to vector<8x32xf32>
    %258 = math.tanh %256 : vector<8x32xf32>
    %259 = arith.mulf %257, %258 : vector<8x32xf32>
    %c8_i32_66 = arith.constant 8 : i32
    %260 = arith.muli %c2_i32_59, %c8_i32_66 : i32
    %261 = tpu.assume_multiple %260, 8 : i32
    %262 = arith.index_cast %261 : i32 to index
    %c0_67 = arith.constant 0 : index
    %263 = vector.load %arg16[%262, %c0_67] : memref<64x32xf32, #tpu.memory_space<vmem>>, vector<8x32xf32>
    tpu.vector_store %arg16[%262, %c0_67], %259 {strides = array<i32>} : memref<64x32xf32, #tpu.memory_space<vmem>>, vector<8x32xf32>,
    %c3_i32_68 = arith.constant 3 : i32
    %264 = arith.truncf %259 : vector<8x32xf32> to vector<8x32xbf16>
    %cst_69 = arith.constant dense<0.000000e+00> : vector<8x256xf32>
    %265 = tpu.matmul %264, %163, %cst_69 {dimension_numbers = #tpu.dot_dimension_numbers<[1], [0], [0], [1], [0, 0, 1, 1], [], []>} : vector<8x32xbf16>, vector<32x256xbf16>, vector<8x256xf32> -> vector<8x256xf32>
    %266 = arith.index_cast %c3_i32_68 : i32 to index
    %c0_70 = arith.constant 0 : index
    %267 = vector.load %arg15[%266, %c0_70] : memref<8x256xf32, #tpu.memory_space<vmem>>, vector<1x128xf32>
    %c7_i32_71 = arith.constant 7 : i32
    %268 = arith.subi %c7_i32_71, %c3_i32_68 : i32
    %269 = arith.index_cast %268 : i32 to index
    %c128_72 = arith.constant 128 : index
    %270 = vector.load %arg15[%269, %c128_72] : memref<8x256xf32, #tpu.memory_space<vmem>>, vector<1x128xf32>
    %271 = vector.extract_strided_slice %265 {offsets = [0, 0], sizes = [1, 128], strides = [1, 1]} : vector<8x256xf32> to vector<1x128xf32>
    %272 = arith.addf %271, %267 : vector<1x128xf32>
    %273 = vector.extract_strided_slice %265 {offsets = [1, 128], sizes = [1, 128], strides = [1, 1]} : vector<8x256xf32> to vector<1x128xf32>
    %274 = arith.addf %273, %270 : vector<1x128xf32>
    %cst_73 = arith.constant 0.000000e+00 : f32
    %275 = vector.broadcast %cst_73 : f32 to vector<6x128xf32>
    %276 = tpu.concatenate %272, %274, %275 in 0 : vector<1x128xf32>, vector<1x128xf32>, vector<6x128xf32> -> vector<8x128xf32>
    %277 = vector.extract_strided_slice %276 {offsets = [0, 0], sizes = [8, 96], strides = [1, 1]} : vector<8x128xf32> to vector<8x96xf32>
    %278 = arith.negf %277 : vector<8x96xf32>
    %279 = math.exp %278 : vector<8x96xf32>
    %cst_74 = arith.constant 1.000000e+00 : f32
    %280 = vector.broadcast %cst_74 : f32 to vector<8x96xf32>
    %281 = arith.addf %280, %279 : vector<8x96xf32>
    %282 = arith.divf %280, %281 : vector<8x96xf32>
    %283 = vector.extract_strided_slice %276 {offsets = [0, 96], sizes = [8, 32], strides = [1, 1]} : vector<8x128xf32> to vector<8x32xf32>
    %284 = math.tanh %283 : vector<8x32xf32>
    %285 = vector.extract_strided_slice %282 {offsets = [0, 32], sizes = [8, 32], strides = [1, 1]} : vector<8x96xf32> to vector<8x32xf32>
    %286 = arith.mulf %285, %256 : vector<8x32xf32>
    %287 = vector.extract_strided_slice %282 {offsets = [0, 0], sizes = [8, 32], strides = [1, 1]} : vector<8x96xf32> to vector<8x32xf32>
    %288 = arith.mulf %287, %284 : vector<8x32xf32>
    %289 = arith.addf %286, %288 : vector<8x32xf32>
    %290 = vector.extract_strided_slice %282 {offsets = [0, 64], sizes = [8, 32], strides = [1, 1]} : vector<8x96xf32> to vector<8x32xf32>
    %291 = math.tanh %289 : vector<8x32xf32>
    %292 = arith.mulf %290, %291 : vector<8x32xf32>
    %c8_i32_75 = arith.constant 8 : i32
    %293 = arith.muli %c3_i32_68, %c8_i32_75 : i32
    %294 = tpu.assume_multiple %293, 8 : i32
    %295 = arith.index_cast %294 : i32 to index
    %c0_76 = arith.constant 0 : index
    %296 = vector.load %arg16[%295, %c0_76] : memref<64x32xf32, #tpu.memory_space<vmem>>, vector<8x32xf32>
    tpu.vector_store %arg16[%295, %c0_76], %292 {strides = array<i32>} : memref<64x32xf32, #tpu.memory_space<vmem>>, vector<8x32xf32>,
    %c4_i32_77 = arith.constant 4 : i32
    %297 = arith.truncf %292 : vector<8x32xf32> to vector<8x32xbf16>
    %cst_78 = arith.constant dense<0.000000e+00> : vector<8x256xf32>
    %298 = tpu.matmul %297, %163, %cst_78 {dimension_numbers = #tpu.dot_dimension_numbers<[1], [0], [0], [1], [0, 0, 1, 1], [], []>} : vector<8x32xbf16>, vector<32x256xbf16>, vector<8x256xf32> -> vector<8x256xf32>
    %299 = arith.index_cast %c4_i32_77 : i32 to index
    %c0_79 = arith.constant 0 : index
    %300 = vector.load %arg15[%299, %c0_79] : memref<8x256xf32, #tpu.memory_space<vmem>>, vector<1x128xf32>
    %c7_i32_80 = arith.constant 7 : i32
    %301 = arith.subi %c7_i32_80, %c4_i32_77 : i32
    %302 = arith.index_cast %301 : i32 to index
    %c128_81 = arith.constant 128 : index
    %303 = vector.load %arg15[%302, %c128_81] : memref<8x256xf32, #tpu.memory_space<vmem>>, vector<1x128xf32>
    %304 = vector.extract_strided_slice %298 {offsets = [0, 0], sizes = [1, 128], strides = [1, 1]} : vector<8x256xf32> to vector<1x128xf32>
    %305 = arith.addf %304, %300 : vector<1x128xf32>
    %306 = vector.extract_strided_slice %298 {offsets = [1, 128], sizes = [1, 128], strides = [1, 1]} : vector<8x256xf32> to vector<1x128xf32>
    %307 = arith.addf %306, %303 : vector<1x128xf32>
    %cst_82 = arith.constant 0.000000e+00 : f32
    %308 = vector.broadcast %cst_82 : f32 to vector<6x128xf32>
    %309 = tpu.concatenate %305, %307, %308 in 0 : vector<1x128xf32>, vector<1x128xf32>, vector<6x128xf32> -> vector<8x128xf32>
    %310 = vector.extract_strided_slice %309 {offsets = [0, 0], sizes = [8, 96], strides = [1, 1]} : vector<8x128xf32> to vector<8x96xf32>
    %311 = arith.negf %310 : vector<8x96xf32>
    %312 = math.exp %311 : vector<8x96xf32>
    %cst_83 = arith.constant 1.000000e+00 : f32
    %313 = vector.broadcast %cst_83 : f32 to vector<8x96xf32>
    %314 = arith.addf %313, %312 : vector<8x96xf32>
    %315 = arith.divf %313, %314 : vector<8x96xf32>
    %316 = vector.extract_strided_slice %309 {offsets = [0, 96], sizes = [8, 32], strides = [1, 1]} : vector<8x128xf32> to vector<8x32xf32>
    %317 = math.tanh %316 : vector<8x32xf32>
    %318 = vector.extract_strided_slice %315 {offsets = [0, 32], sizes = [8, 32], strides = [1, 1]} : vector<8x96xf32> to vector<8x32xf32>
    %319 = arith.mulf %318, %289 : vector<8x32xf32>
    %320 = vector.extract_strided_slice %315 {offsets = [0, 0], sizes = [8, 32], strides = [1, 1]} : vector<8x96xf32> to vector<8x32xf32>
    %321 = arith.mulf %320, %317 : vector<8x32xf32>
    %322 = arith.addf %319, %321 : vector<8x32xf32>
    %323 = vector.extract_strided_slice %315 {offsets = [0, 64], sizes = [8, 32], strides = [1, 1]} : vector<8x96xf32> to vector<8x32xf32>
    %324 = math.tanh %322 : vector<8x32xf32>
    %325 = arith.mulf %323, %324 : vector<8x32xf32>
    %c8_i32_84 = arith.constant 8 : i32
    %326 = arith.muli %c4_i32_77, %c8_i32_84 : i32
    %327 = tpu.assume_multiple %326, 8 : i32
    %328 = arith.index_cast %327 : i32 to index
    %c0_85 = arith.constant 0 : index
    %329 = vector.load %arg16[%328, %c0_85] : memref<64x32xf32, #tpu.memory_space<vmem>>, vector<8x32xf32>
    tpu.vector_store %arg16[%328, %c0_85], %325 {strides = array<i32>} : memref<64x32xf32, #tpu.memory_space<vmem>>, vector<8x32xf32>,
    %c5_i32_86 = arith.constant 5 : i32
    %330 = arith.truncf %325 : vector<8x32xf32> to vector<8x32xbf16>
    %cst_87 = arith.constant dense<0.000000e+00> : vector<8x256xf32>
    %331 = tpu.matmul %330, %163, %cst_87 {dimension_numbers = #tpu.dot_dimension_numbers<[1], [0], [0], [1], [0, 0, 1, 1], [], []>} : vector<8x32xbf16>, vector<32x256xbf16>, vector<8x256xf32> -> vector<8x256xf32>
    %332 = arith.index_cast %c5_i32_86 : i32 to index
    %c0_88 = arith.constant 0 : index
    %333 = vector.load %arg15[%332, %c0_88] : memref<8x256xf32, #tpu.memory_space<vmem>>, vector<1x128xf32>
    %c7_i32_89 = arith.constant 7 : i32
    %334 = arith.subi %c7_i32_89, %c5_i32_86 : i32
    %335 = arith.index_cast %334 : i32 to index
    %c128_90 = arith.constant 128 : index
    %336 = vector.load %arg15[%335, %c128_90] : memref<8x256xf32, #tpu.memory_space<vmem>>, vector<1x128xf32>
    %337 = vector.extract_strided_slice %331 {offsets = [0, 0], sizes = [1, 128], strides = [1, 1]} : vector<8x256xf32> to vector<1x128xf32>
    %338 = arith.addf %337, %333 : vector<1x128xf32>
    %339 = vector.extract_strided_slice %331 {offsets = [1, 128], sizes = [1, 128], strides = [1, 1]} : vector<8x256xf32> to vector<1x128xf32>
    %340 = arith.addf %339, %336 : vector<1x128xf32>
    %cst_91 = arith.constant 0.000000e+00 : f32
    %341 = vector.broadcast %cst_91 : f32 to vector<6x128xf32>
    %342 = tpu.concatenate %338, %340, %341 in 0 : vector<1x128xf32>, vector<1x128xf32>, vector<6x128xf32> -> vector<8x128xf32>
    %343 = vector.extract_strided_slice %342 {offsets = [0, 0], sizes = [8, 96], strides = [1, 1]} : vector<8x128xf32> to vector<8x96xf32>
    %344 = arith.negf %343 : vector<8x96xf32>
    %345 = math.exp %344 : vector<8x96xf32>
    %cst_92 = arith.constant 1.000000e+00 : f32
    %346 = vector.broadcast %cst_92 : f32 to vector<8x96xf32>
    %347 = arith.addf %346, %345 : vector<8x96xf32>
    %348 = arith.divf %346, %347 : vector<8x96xf32>
    %349 = vector.extract_strided_slice %342 {offsets = [0, 96], sizes = [8, 32], strides = [1, 1]} : vector<8x128xf32> to vector<8x32xf32>
    %350 = math.tanh %349 : vector<8x32xf32>
    %351 = vector.extract_strided_slice %348 {offsets = [0, 32], sizes = [8, 32], strides = [1, 1]} : vector<8x96xf32> to vector<8x32xf32>
    %352 = arith.mulf %351, %322 : vector<8x32xf32>
    %353 = vector.extract_strided_slice %348 {offsets = [0, 0], sizes = [8, 32], strides = [1, 1]} : vector<8x96xf32> to vector<8x32xf32>
    %354 = arith.mulf %353, %350 : vector<8x32xf32>
    %355 = arith.addf %352, %354 : vector<8x32xf32>
    %356 = vector.extract_strided_slice %348 {offsets = [0, 64], sizes = [8, 32], strides = [1, 1]} : vector<8x96xf32> to vector<8x32xf32>
    %357 = math.tanh %355 : vector<8x32xf32>
    %358 = arith.mulf %356, %357 : vector<8x32xf32>
    %c8_i32_93 = arith.constant 8 : i32
    %359 = arith.muli %c5_i32_86, %c8_i32_93 : i32
    %360 = tpu.assume_multiple %359, 8 : i32
    %361 = arith.index_cast %360 : i32 to index
    %c0_94 = arith.constant 0 : index
    %362 = vector.load %arg16[%361, %c0_94] : memref<64x32xf32, #tpu.memory_space<vmem>>, vector<8x32xf32>
    tpu.vector_store %arg16[%361, %c0_94], %358 {strides = array<i32>} : memref<64x32xf32, #tpu.memory_space<vmem>>, vector<8x32xf32>,
    %c6_i32_95 = arith.constant 6 : i32
    %363 = arith.truncf %358 : vector<8x32xf32> to vector<8x32xbf16>
    %cst_96 = arith.constant dense<0.000000e+00> : vector<8x256xf32>
    %364 = tpu.matmul %363, %163, %cst_96 {dimension_numbers = #tpu.dot_dimension_numbers<[1], [0], [0], [1], [0, 0, 1, 1], [], []>} : vector<8x32xbf16>, vector<32x256xbf16>, vector<8x256xf32> -> vector<8x256xf32>
    %365 = arith.index_cast %c6_i32_95 : i32 to index
    %c0_97 = arith.constant 0 : index
    %366 = vector.load %arg15[%365, %c0_97] : memref<8x256xf32, #tpu.memory_space<vmem>>, vector<1x128xf32>
    %c7_i32_98 = arith.constant 7 : i32
    %367 = arith.subi %c7_i32_98, %c6_i32_95 : i32
    %368 = arith.index_cast %367 : i32 to index
    %c128_99 = arith.constant 128 : index
    %369 = vector.load %arg15[%368, %c128_99] : memref<8x256xf32, #tpu.memory_space<vmem>>, vector<1x128xf32>
    %370 = vector.extract_strided_slice %364 {offsets = [0, 0], sizes = [1, 128], strides = [1, 1]} : vector<8x256xf32> to vector<1x128xf32>
    %371 = arith.addf %370, %366 : vector<1x128xf32>
    %372 = vector.extract_strided_slice %364 {offsets = [1, 128], sizes = [1, 128], strides = [1, 1]} : vector<8x256xf32> to vector<1x128xf32>
    %373 = arith.addf %372, %369 : vector<1x128xf32>
    %cst_100 = arith.constant 0.000000e+00 : f32
    %374 = vector.broadcast %cst_100 : f32 to vector<6x128xf32>
    %375 = tpu.concatenate %371, %373, %374 in 0 : vector<1x128xf32>, vector<1x128xf32>, vector<6x128xf32> -> vector<8x128xf32>
    %376 = vector.extract_strided_slice %375 {offsets = [0, 0], sizes = [8, 96], strides = [1, 1]} : vector<8x128xf32> to vector<8x96xf32>
    %377 = arith.negf %376 : vector<8x96xf32>
    %378 = math.exp %377 : vector<8x96xf32>
    %cst_101 = arith.constant 1.000000e+00 : f32
    %379 = vector.broadcast %cst_101 : f32 to vector<8x96xf32>
    %380 = arith.addf %379, %378 : vector<8x96xf32>
    %381 = arith.divf %379, %380 : vector<8x96xf32>
    %382 = vector.extract_strided_slice %375 {offsets = [0, 96], sizes = [8, 32], strides = [1, 1]} : vector<8x128xf32> to vector<8x32xf32>
    %383 = math.tanh %382 : vector<8x32xf32>
    %384 = vector.extract_strided_slice %381 {offsets = [0, 32], sizes = [8, 32], strides = [1, 1]} : vector<8x96xf32> to vector<8x32xf32>
    %385 = arith.mulf %384, %355 : vector<8x32xf32>
    %386 = vector.extract_strided_slice %381 {offsets = [0, 0], sizes = [8, 32], strides = [1, 1]} : vector<8x96xf32> to vector<8x32xf32>
    %387 = arith.mulf %386, %383 : vector<8x32xf32>
    %388 = arith.addf %385, %387 : vector<8x32xf32>
    %389 = vector.extract_strided_slice %381 {offsets = [0, 64], sizes = [8, 32], strides = [1, 1]} : vector<8x96xf32> to vector<8x32xf32>
    %390 = math.tanh %388 : vector<8x32xf32>
    %391 = arith.mulf %389, %390 : vector<8x32xf32>
    %c8_i32_102 = arith.constant 8 : i32
    %392 = arith.muli %c6_i32_95, %c8_i32_102 : i32
    %393 = tpu.assume_multiple %392, 8 : i32
    %394 = arith.index_cast %393 : i32 to index
    %c0_103 = arith.constant 0 : index
    %395 = vector.load %arg16[%394, %c0_103] : memref<64x32xf32, #tpu.memory_space<vmem>>, vector<8x32xf32>
    tpu.vector_store %arg16[%394, %c0_103], %391 {strides = array<i32>} : memref<64x32xf32, #tpu.memory_space<vmem>>, vector<8x32xf32>,
    %c7_i32_104 = arith.constant 7 : i32
    %396 = arith.truncf %391 : vector<8x32xf32> to vector<8x32xbf16>
    %cst_105 = arith.constant dense<0.000000e+00> : vector<8x256xf32>
    %397 = tpu.matmul %396, %163, %cst_105 {dimension_numbers = #tpu.dot_dimension_numbers<[1], [0], [0], [1], [0, 0, 1, 1], [], []>} : vector<8x32xbf16>, vector<32x256xbf16>, vector<8x256xf32> -> vector<8x256xf32>
    %398 = arith.index_cast %c7_i32_104 : i32 to index
    %c0_106 = arith.constant 0 : index
    %399 = vector.load %arg15[%398, %c0_106] : memref<8x256xf32, #tpu.memory_space<vmem>>, vector<1x128xf32>
    %c7_i32_107 = arith.constant 7 : i32
    %400 = arith.subi %c7_i32_107, %c7_i32_104 : i32
    %401 = arith.index_cast %400 : i32 to index
    %c128_108 = arith.constant 128 : index
    %402 = vector.load %arg15[%401, %c128_108] : memref<8x256xf32, #tpu.memory_space<vmem>>, vector<1x128xf32>
    %403 = vector.extract_strided_slice %397 {offsets = [0, 0], sizes = [1, 128], strides = [1, 1]} : vector<8x256xf32> to vector<1x128xf32>
    %404 = arith.addf %403, %399 : vector<1x128xf32>
    %405 = vector.extract_strided_slice %397 {offsets = [1, 128], sizes = [1, 128], strides = [1, 1]} : vector<8x256xf32> to vector<1x128xf32>
    %406 = arith.addf %405, %402 : vector<1x128xf32>
    %cst_109 = arith.constant 0.000000e+00 : f32
    %407 = vector.broadcast %cst_109 : f32 to vector<6x128xf32>
    %408 = tpu.concatenate %404, %406, %407 in 0 : vector<1x128xf32>, vector<1x128xf32>, vector<6x128xf32> -> vector<8x128xf32>
    %409 = vector.extract_strided_slice %408 {offsets = [0, 0], sizes = [8, 96], strides = [1, 1]} : vector<8x128xf32> to vector<8x96xf32>
    %410 = arith.negf %409 : vector<8x96xf32>
    %411 = math.exp %410 : vector<8x96xf32>
    %cst_110 = arith.constant 1.000000e+00 : f32
    %412 = vector.broadcast %cst_110 : f32 to vector<8x96xf32>
    %413 = arith.addf %412, %411 : vector<8x96xf32>
    %414 = arith.divf %412, %413 : vector<8x96xf32>
    %415 = vector.extract_strided_slice %408 {offsets = [0, 96], sizes = [8, 32], strides = [1, 1]} : vector<8x128xf32> to vector<8x32xf32>
    %416 = math.tanh %415 : vector<8x32xf32>
    %417 = vector.extract_strided_slice %414 {offsets = [0, 32], sizes = [8, 32], strides = [1, 1]} : vector<8x96xf32> to vector<8x32xf32>
    %418 = arith.mulf %417, %388 : vector<8x32xf32>
    %419 = vector.extract_strided_slice %414 {offsets = [0, 0], sizes = [8, 32], strides = [1, 1]} : vector<8x96xf32> to vector<8x32xf32>
    %420 = arith.mulf %419, %416 : vector<8x32xf32>
    %421 = arith.addf %418, %420 : vector<8x32xf32>
    %422 = vector.extract_strided_slice %414 {offsets = [0, 64], sizes = [8, 32], strides = [1, 1]} : vector<8x96xf32> to vector<8x32xf32>
    %423 = math.tanh %421 : vector<8x32xf32>
    %424 = arith.mulf %422, %423 : vector<8x32xf32>
    %c8_i32_111 = arith.constant 8 : i32
    %425 = arith.muli %c7_i32_104, %c8_i32_111 : i32
    %426 = tpu.assume_multiple %425, 8 : i32
    %427 = arith.index_cast %426 : i32 to index
    %c0_112 = arith.constant 0 : index
    %428 = vector.load %arg16[%427, %c0_112] : memref<64x32xf32, #tpu.memory_space<vmem>>, vector<8x32xf32>
    tpu.vector_store %arg16[%427, %c0_112], %424 {strides = array<i32>} : memref<64x32xf32, #tpu.memory_space<vmem>>, vector<8x32xf32>,
    %c8_i32_113 = arith.constant 8 : i32
    %c0_114 = arith.constant 0 : index
    %c0_115 = arith.constant 0 : index
    %429 = vector.load %arg16[%c0_114, %c0_115] : memref<64x32xf32, #tpu.memory_space<vmem>>, vector<64x32xf32>
    %c0_116 = arith.constant 0 : index
    %c0_117 = arith.constant 0 : index
    %430 = vector.load %arg7[%c0_116, %c0_117] : memref<24x64xf32, #tpu.memory_space<vmem>>, vector<24x64xf32>
    %cst_118 = arith.constant dense<0.000000e+00> : vector<24x32xf32>
    %431 = tpu.matmul %430, %429, %cst_118 {dimension_numbers = #tpu.dot_dimension_numbers<[1], [0], [0], [1], [0, 0, 1, 1], [], []>} : vector<24x64xf32>, vector<64x32xf32>, vector<24x32xf32> -> vector<24x32xf32>
    %c0_119 = arith.constant 0 : index
    %c0_120 = arith.constant 0 : index
    %432 = vector.load %arg8[%c0_119, %c0_120] : memref<24x64xf32, #tpu.memory_space<vmem>>, vector<24x64xf32>
    %cst_121 = arith.constant dense<0.000000e+00> : vector<24x32xf32>
    %433 = tpu.matmul %432, %429, %cst_121 {dimension_numbers = #tpu.dot_dimension_numbers<[1], [0], [0], [1], [0, 0, 1, 1], [], []>} : vector<24x64xf32>, vector<64x32xf32>, vector<24x32xf32> -> vector<24x32xf32>
    %cst_122 = arith.constant 0.000000e+00 : f32
    %434 = vector.broadcast %cst_122 : f32 to vector<24x64xf32>
    %435 = tpu.concatenate %431, %433, %434 in 1 : vector<24x32xf32>, vector<24x32xf32>, vector<24x64xf32> -> vector<24x128xf32>
    %436 = arith.truncf %435 : vector<24x128xf32> to vector<24x128xbf16>
    %c0_123 = arith.constant 0 : index
    %c0_124 = arith.constant 0 : index
    %437 = vector.load %arg9[%c0_123, %c0_124] : memref<128x128xbf16, #tpu.memory_space<vmem>>, vector<128x128xbf16>
    %cst_125 = arith.constant dense<0.000000e+00> : vector<24x128xf32>
    %438 = tpu.matmul %436, %437, %cst_125 {dimension_numbers = #tpu.dot_dimension_numbers<[1], [0], [0], [1], [0, 0, 1, 1], [], []>} : vector<24x128xbf16>, vector<128x128xbf16>, vector<24x128xf32> -> vector<24x128xf32>
    %c0_126 = arith.constant 0 : index
    %c0_127 = arith.constant 0 : index
    %439 = vector.load %arg10[%c0_126, %c0_127] : memref<1x128xf32, #tpu.memory_space<vmem>>, vector<1x128xf32>
    %440 = vector.broadcast %439 : vector<1x128xf32> to vector<24x128xf32>
    %441 = arith.addf %438, %440 : vector<24x128xf32>
    %cst_128 = arith.constant 0.000000e+00 : f32
    %442 = vector.broadcast %cst_128 : f32 to vector<24x128xf32>
    %443 = arith.maximumf %441, %442 : vector<24x128xf32>
    %444 = arith.truncf %443 : vector<24x128xf32> to vector<24x128xbf16>
    %c0_129 = arith.constant 0 : index
    %c0_130 = arith.constant 0 : index
    %445 = vector.load %arg11[%c0_129, %c0_130] : memref<128x128xbf16, #tpu.memory_space<vmem>>, vector<128x128xbf16>
    %cst_131 = arith.constant dense<0.000000e+00> : vector<24x128xf32>
    %446 = tpu.matmul %444, %445, %cst_131 {dimension_numbers = #tpu.dot_dimension_numbers<[1], [0], [0], [1], [0, 0, 1, 1], [], []>} : vector<24x128xbf16>, vector<128x128xbf16>, vector<24x128xf32> -> vector<24x128xf32>
    %c0_132 = arith.constant 0 : index
    %c0_133 = arith.constant 0 : index
    %447 = vector.load %arg12[%c0_132, %c0_133] : memref<1x128xf32, #tpu.memory_space<vmem>>, vector<1x128xf32>
    %448 = vector.broadcast %447 : vector<1x128xf32> to vector<24x128xf32>
    %449 = arith.addf %446, %448 : vector<24x128xf32>
    %450 = tpu.iota {dimensions = array<i32: 1>} : vector<24x128xi32>
    %c0_i32_134 = arith.constant 0 : i32
    %451 = vector.broadcast %c0_i32_134 : i32 to vector<24x128xi32>
    %452 = arith.cmpi eq, %450, %451 : vector<24x128xi32>
    %cst_135 = arith.constant 0.000000e+00 : f32
    %453 = vector.broadcast %cst_135 : f32 to vector<24x128xf32>
    %454 = arith.select %452, %453, %449 : vector<24x128xi1>, vector<24x128xf32>
    %c0_136 = arith.constant 0 : index
    %c0_137 = arith.constant 0 : index
    %455 = vector.load %arg13[%c0_136, %c0_137] : memref<24x128xf32, #tpu.memory_space<vmem>>, vector<24x128xf32>
    tpu.vector_store %arg13[%c0_136, %c0_137], %454 {strides = array<i32>} : memref<24x128xf32, #tpu.memory_space<vmem>>, vector<24x128xf32>,
    return
  }
}

</mosaic_0001>

<bundles_post_ra>
// kernel: parser_forward.1
= control target key start
LH: loop header
LB: loop body
LE: loop exit
PB: predicated region body
PF: predicated region fallthrough
CT: control target
= control target key end

     0   :  { %vm98_vm0 = vcmask 130048   ;;  %v2350_v20 = vmov 0   ;;  %v206_v37 = vlaneseq  ;;  %s2352_s21 = smov 64   ;;  %vm231_vm10 = vcmask 261120   ;;  %s2353_s29 = smov 96   ;;  %s2977_s1 = inlined_call_operand.vmem [shape: bf16[16,256], index: 1, kind: input, shape index: {}]   ;;  %s2978_s0 = inlined_call_operand.vmem [shape: bf16[80,16], index: 0, kind: input, shape index: {}]   ;;  %s2979_s2 = inlined_call_operand.vmem [shape: bf16[32,256], index: 2, kind: input, shape index: {}]   ;;  %s2980_s3 = inlined_call_operand.vmem [shape: f32[1,256], index: 3, kind: input, shape index: {}]   ;;  %s2981_s4 = inlined_call_operand.vmem [shape: bf16[64,256], index: 4, kind: input, shape index: {}]   ;;  %s2982_s5 = inlined_call_operand.vmem [shape: bf16[32,256], index: 5, kind: input, shape index: {}]   ;;  %s2983_s6 = inlined_call_operand.vmem [shape: f32[1,256], index: 6, kind: input, shape index: {}]   ;;  %s2984_s8 = inlined_call_operand.vmem [shape: f32[24,64], index: 8, kind: input, shape index: {}]   ;;  %s2985_s7 = inlined_call_operand.vmem [shape: f32[24,64], index: 7, kind: input, shape index: {}]   ;;  %s2986_s9 = inlined_call_operand.vmem [shape: bf16[128,128], index: 9, kind: input, shape index: {}]   ;;  %s2987_s10 = inlined_call_operand.vmem [shape: f32[1,128], index: 10, kind: input, shape index: {}]   ;;  %s2988_s11 = inlined_call_operand.vmem [shape: bf16[128,128], index: 11, kind: input, shape index: {}]   ;;  %s2989_s12 = inlined_call_operand.vmem [shape: f32[1,128], index: 12, kind: input, shape index: {}]   ;;  %s2990_s13 = inlined_call_operand.vmem [shape: f32[24,128], index: 13, kind: output, shape index: {}]  }
   0x1   :  { %v1955_v0 = vld [vmem:[%s2977_s1] sm:$0xf]  ;;  %v2159_v1 = vld [vmem:[%s2977_s1 + $0x4] sm:$0xf0]  ;;  %v2158_v2 = vld [vmem:[%s2977_s1 + $0x4] sm:$0xf] }
   0x2   :  { %v1956_v3 = vor.u32 %v2159_v1, %v1955_v0  ;;  %v1957_v4 = vld [vmem:[%s2977_s1 + $0x8] sm:$0xf0]  ;;  %v2157_v5 = vld [vmem:[%s2978_s0 + $0x20] sm:$0xff]  ;;  %v1981_v6 = vld [vmem:[%s2979_s2 + $0x10] sm:$0xf]  ;;  %v2515_v43 = vshrl.u32 %v206_v37, 7 }
   0x3   :  { %v1960_v7 = vor.u32 %v2158_v2, %v1957_v4  ;;  %v2163_v8 = vld [vmem:[%s2979_s2 + $0x14] sm:$0xf0]  ;;  %v2162_v9 = vld [vmem:[%s2979_s2 + $0x14] sm:$0xf]  ;;  %v1983_v10 = vld [vmem:[%s2979_s2 + $0x18] sm:$0xf0] }
   0x4   :  { %2192 = vmatpush.bf16.msra.mxu2 %v1956_v3  ;;  %v2452_v11 = vor.u32 %v2163_v8, %v1981_v6  ;;  %v2454_v12 = vor.u32 %v2162_v9, %v1983_v10  ;;  %121 = vmatpush.bf16.msra.mxu0 %v1956_v3  ;;  %v2153_v13 = vld [vmem:[%s2978_s0] sm:$0xff]  ;;  %v2161_v15 = vld [vmem:[%s2979_s2 + $0x4] sm:$0xf0]  ;;  %v1975_v17 = vld [vmem:[%s2979_s2 + $0x8] sm:$0xf0]  ;;  %vm209_vm1 = vcmp.lt.s32.totalorder %v2515_v43, 6 }
   0x5   :  { %v1973_v14 = vld [vmem:[%s2979_s2] sm:$0xf]  ;;  %2193 = vmatpush.bf16.msra.mxu3 %v1960_v7  ;;  %155 = vmatpush.bf16.msra.mxu1 %v1960_v7  ;;  %v2160_v16 = vld [vmem:[%s2979_s2 + $0x4] sm:$0xf] }
   0x6   :  { %v2473_v18 = vor.u32 %v2161_v15, %v1973_v14  ;;  %v2475_v19 = vor.u32 %v2160_v16, %v1975_v17  ;;  %v57_v21 = vld [vmem:[%s2980_s3] sm:$0x3]  ;;  %s2351_s3 = smov 32  }
   0x7   :  { %1965 = vmatmul.msk.bf16.vlgmr.msra.gmra.mxu2 %vm98_vm0, %v2157_v5  ;;  %1961 = vmatmul.msk.bf16.vlgmr.msra.gmra.mxu0 %vm98_vm0, %v2153_v13  ;;  %v2496_v22 = vperm.slane %v57_v21, 0  ;;  %v2498_v23 = vperm.slane %v57_v21, 1 }
   0x8   :  { %241 = vmatpush.bf16.msrb.mxu2 %v2452_v11  ;;  %1970 = vmatmul.msk.bf16.vlgmr.msra.gmra.mxu3 %vm98_vm0, %v2157_v5 }
   0x9   :  { %255 = vmatpush.bf16.msrb.mxu3 %v2454_v12  ;;  %1966 = vmatmul.msk.bf16.vlgmr.msra.gmra.mxu1 %vm98_vm0, %v2153_v13 }
   0xc   :  { %242 = vmatpush.bf16.msrb.mxu2 %v2473_v18 }
   0xd   :  { %256 = vmatpush.bf16.msrb.mxu3 %v2475_v19 }
  0x10   :  { %365 = vmatpush.bf16.msra.mxu2 %v2452_v11 }
  0x11   :  { %379 = vmatpush.bf16.msra.mxu3 %v2454_v12 }
  0x14   :  { %366 = vmatpush.bf16.msra.mxu2 %v2473_v18 }
  0x15   :  { %380 = vmatpush.bf16.msra.mxu3 %v2475_v19 }
  0x17   :  { %243 = vmatmul.bf16.vlgmr.msrb.gmra.mxu2 %v2350_v20 }
  0x18   :  { %257 = vmatmul.bf16.vlgmr.msrb.gmra.mxu3 %v2350_v20  ;;  %489 = vmatpush.bf16.msrb.mxu2 %v2452_v11 }
  0x19   :  { %503 = vmatpush.bf16.msrb.mxu3 %v2454_v12 }
  0x1c   :  { %490 = vmatpush.bf16.msrb.mxu2 %v2473_v18 }
  0x1d   :  { %504 = vmatpush.bf16.msrb.mxu3 %v2475_v19 }
  0x84   :  { %v123_v28 = vpop.f32.mrf.mxu0 }
  0x85   :  { %v124_v31 = vadd.f32 %v123_v28, %v2496_v22 }
  0x86   :  { %v157_v29 = vpop.f32.mrf.mxu1 }
  0x87   :  { %v158_v32 = vadd.f32 %v157_v29, %v2498_v23 }
  0x89   :  { %v182_v34 = vpack.c.bf16 %v158_v32, %v124_v31 }
  0x8a   :  { %v143_v24 = vpop.f32.mrf.mxu2 }
  0x8b   :  { %v144_v25 = vadd.f32 %v143_v24, %v2496_v22  ;;  %v177_v26 = vpop.f32.mrf.mxu3  ;;  %v268_v42 = vunpack.c.l.bf16 %v182_v34  ;;  %v269_v44 = vunpack.c.h.bf16 %v182_v34 }
  0x8c   :  { %v178_v27 = vadd.f32 %v177_v26, %v2498_v23  ;;  %v125_v40 = vpop.f32.mrf.mxu0 }
  0x8d   :  { %v126_v45 = vadd.f32 %v125_v40, %v2496_v22 }
  0x8e   :  { %v2502_v30 = vpack.c.bf16 %v178_v27, %v144_v25  ;;  %v159_v41 = vpop.f32.mrf.mxu1 }
  0x8f   :  { %v160_v46 = vadd.f32 %v159_v41, %v2498_v23 }
  0x91   :  { %v183_v51 = vpack.c.bf16 %v160_v46, %v126_v45  ;;  %v2154_v46 = vld [vmem:[%s2978_s0 + $0x8] sm:$0xff] }
  0x92   :  { %v145_v33 = vpop.f32.mrf.mxu2  ;;  %1962 = vmatmul.msk.bf16.gmra.mxu0 %vm98_vm0, %v2154_v46  ;;  %1967 = vmatmul.msk.bf16.gmra.mxu1 %vm98_vm0, %v2154_v46 }
  0x93   :  { %v2507_v35 = vadd.f32 %v145_v33, %v2496_v22  ;;  %v179_v36 = vpop.f32.mrf.mxu3  ;;  %v271_v54 = vunpack.c.h.bf16 %v183_v51 }
  0x94   :  { %v2510_v38 = vadd.f32 %v179_v36, %v2498_v23 }
  0x96   :  { %v191_v39 = vpack.c.bf16 %v2510_v38, %v2507_v35 }
  0x9a   :  { %v244_v47 = vpop.f32.mrf.mxu2 }
  0x9b   :  { %v272_v48 = vadd.f32 %v268_v42, %v244_v47  ;;  %v258_v49 = vpop.f32.mrf.mxu3 }
  0x9c   :  { %v273_v50 = vadd.f32 %v269_v44, %v258_v49 }
  0x9e   :  { %v276_v52 = vsel %vm209_vm1, %v272_v48, %v273_v50 }
  0x9f   :  { %2206 = vtanh.f32 %v276_v52  ;;  %v1987_v59 = vmul.f32 -1.442695, %v276_v52 }
  0xa2   :  { %v246_v53 = vpop.f32.mrf.mxu2 }
  0xa3   :  { %v260_v55 = vpop.f32.mrf.mxu3 }
  0xa4   :  { %v275_v56 = vadd.f32 %v271_v54, %v260_v55 }
  0xa5   :  { %v2207_v57 = vpop.eup %2206 }
  0xa6   :  { %2208 = vtanh.f32 %v275_v56  ;;  %322 = vrot.lane.b32.xlu0 %v2207_v57, %s2351_s3  ;;  %v1988_v60 = vmul.f32 -1.442695, %v275_v56 }
  0xa7   :  { %2210 = vpow2.f32 %v1987_v59 }
  0xa8   :  { %2212 = vpow2.f32 %v1988_v60 }
  0xac   :  { %v2209_v58 = vpop.eup %2208 }
  0xad   :  { %v2211_v61 = vpop.eup %2210 }
  0xae   :  { %324 = vrot.lane.b32.xlu0 %v2209_v58, %s2351_s3  ;;  %v284_v62 = vadd.f32 1.0, %v2211_v61  ;;  %v2213_v63 = vpop.eup %2212 }
  0xaf   :  { %v285_v0 = vadd.f32 1.0, %v2213_v63 }
  0xb0   :  { %2214 = vrcp.f32 %v284_v62  ;;  %v297_v9 = vand.u32 2147483648, %v284_v62  ;;  %vm291_vm3 = vweird.f32 %v284_v62  ;;  %v295_v10 = vand.u32 2147483647, %v284_v62 }
  0xb1   :  { %2216 = vrcp.f32 %v285_v0  ;;  %v312_v25 = vand.u32 2147483648, %v285_v0  ;;  %vm306_vm7 = vweird.f32 %v285_v0  ;;  %v310_v26 = vand.u32 2147483647, %v285_v0 }
  0xb2   :  { %v298_v15 = vor.u32 1.1754944e-38, %v297_v9  ;;  %vm296_vm5 = vcmp.eq.f32.partialorder %v295_v10, 8.507059e+37 }
  0xb3   :  { %v313_v28 = vor.u32 1.1754944e-38, %v312_v25  ;;  %vm311_vm9 = vcmp.eq.f32.partialorder %v310_v26, 8.507059e+37 }
  0xb6   :  { %v2215_v1 = vpop.eup %2214 }
  0xb7   :  { %v287_v2 = vmul.f32 %v2215_v1, %v284_v62  ;;  %v2217_v4 = vpop.eup %2216  ;;  %vm292_vm2 = vweird.f32 %v2215_v1 }
  0xb8   :  { %v302_v6 = vmul.f32 %v2217_v4, %v285_v0  ;;  %vm293_vm4 = vmor %vm291_vm3, %vm292_vm2  ;;  %vm307_vm6 = vweird.f32 %v2217_v4 }
  0xb9   :  { %v288_v3 = vsub.f32 1.0, %v287_v2  ;;  %vm308_vm8 = vmor %vm306_vm7, %vm307_vm6 }
  0xba   :  { %v303_v8 = vsub.f32 1.0, %v302_v6 }
  0xbb   :  { %v289_v5 = vmul.f32 %v2215_v1, %v288_v3 }
  0xbc   :  { %v304_v14 = vmul.f32 %v2217_v4, %v303_v8 }
  0xbd   :  { %v290_v7 = vadd.f32 %v2215_v1, %v289_v5 }
  0xbe   :  { %v305_v24 = vadd.f32 %v2217_v4, %v304_v14 }
  0xbf   :  { %v294_v13 = vsel %vm293_vm4, %v2215_v1, %v290_v7 }
  0xc0   :  { %v299_v17 = vsel %vm296_vm5, %v298_v15, %v294_v13  ;;  %v309_v27 = vsel %vm308_vm8, %v2217_v4, %v305_v24 }
  0xc1   :  { %v314_v29 = vsel %vm311_vm9, %v313_v28, %v309_v27  ;;  %v318_v33 = vmul.f32 0.0, %v299_v17 }
  0xc2   :  { %v319_v40 = vmul.f32 0.0, %v314_v29 }
 0x10f   :  { %v128_v53 = vpop.f32.mrf.mxu0  ;;  %v162_v54 = vpop.f32.mrf.mxu1 }
 0x110   :  { %v129_v55 = vadd.f32 %v128_v53, %v2496_v22  ;;  %v163_v56 = vadd.f32 %v162_v54, %v2498_v23 }
 0x112   :  { %v184_v57 = vpack.c.bf16 %v163_v56, %v129_v55 }
 0x114   :  { %v392_v60 = vunpack.c.l.bf16 %v184_v57  ;;  %v393_v61 = vunpack.c.h.bf16 %v184_v57 }
 0x117   :  { %v130_v58 = vpop.f32.mrf.mxu0  ;;  %v164_v59 = vpop.f32.mrf.mxu1 }
 0x118   :  { %v323_v16 = vpop.permute.xlu0 %322  ;;  %v131_v62 = vadd.f32 %v130_v58, %v2496_v22  ;;  %v165_v63 = vadd.f32 %v164_v59, %v2498_v23 }
 0x119   :  { %v328_v21 = vmul.f32 %v323_v16, %v299_v17 }
 0x11a   :  { %v185_v4 = vpack.c.bf16 %v165_v63, %v131_v62 }
 0x11b   :  { %332 = vrot.lane.b32.xlu1 %v328_v21, %s2351_s3 }
 0x11c   :  { %v395_v6 = vunpack.c.h.bf16 %v185_v4 }
 0x120   :  { %v325_v31 = vpop.permute.xlu0 %324 }
 0x121   :  { %v329_v32 = vmul.f32 %v325_v31, %v314_v29 }
 0x123   :  { %334 = vrot.lane.b32.xlu1 %v329_v32, %s2351_s3 }
 0x18d   :  { %v333_v34 = vpop.permute.xlu1 %332 }
 0x18e   :  { %v2526_v36 = vadd.f32 %v333_v34, %v318_v33 }
 0x190   :  { %2218 = vtanh.f32 %v2526_v36 }
 0x195   :  { %v335_v41 = vpop.permute.xlu1 %334 }
 0x196   :  { %v2219_v42 = vpop.eup %2218  ;;  %v2529_v44 = vadd.f32 %v335_v41, %v319_v40 }
 0x197   :  { %344 = vrot.lane.b32.xlu2 %v2219_v42, %s2351_s3 }
 0x198   :  { %2220 = vtanh.f32 %v2529_v44 }
 0x19e   :  { %v2221_v45 = vpop.eup %2220 }
 0x19f   :  { %346 = vrot.lane.b32.xlu2 %v2221_v45, %s2351_s3 }
 0x1f1   :  { %v345_v47 = vpop.permute.xlu2 %344 }
 0x1f2   :  { %v350_v49 = vmul.f32 %v345_v47, %v299_v17 }
 0x1f9   :  { %v347_v48 = vpop.permute.xlu2 %346 }
 0x1fa   :  { %v351_v50 = vmul.f32 %v347_v48, %v314_v29 }
 0x1fc   :  { %v352_v51 = vpack.c.bf16 %v351_v50, %v350_v49 }
 0x1fe   :  { %354 = vrot.lane.b32.xlu0 %v352_v51, %s2352_s21 }
 0x270   :  { %v355_v52 = vpop.permute.xlu0 %354 }
 0x271   :  { %1989 = vmatmul.msk.bf16.vlgmr.msra.gmra.mxu2 %vm231_vm10, %v355_v52  ;;  %1990 = vmatmul.msk.bf16.vlgmr.msra.gmra.mxu3 %vm231_vm10, %v355_v52 }
 0x272   :  { %627 = vmatpush.bf16.msra.mxu3 %v2454_v12  ;;  %613 = vmatpush.bf16.msra.mxu2 %v2452_v11 }
 0x276   :  { %628 = vmatpush.bf16.msra.mxu3 %v2475_v19  ;;  %614 = vmatpush.bf16.msra.mxu2 %v2473_v18 }
 0x2f4   :  { %v368_v0 = vpop.f32.mrf.mxu2  ;;  %v382_v1 = vpop.f32.mrf.mxu3 }
 0x2f5   :  { %v396_v2 = vadd.f32 %v392_v60, %v368_v0  ;;  %v397_v3 = vadd.f32 %v393_v61, %v382_v1 }
 0x2f7   :  { %v400_v5 = vsel %vm209_vm1, %v396_v2, %v397_v3 }
 0x2f8   :  { %2222 = vtanh.f32 %v400_v5  ;;  %v1991_v17 = vmul.f32 -1.442695, %v400_v5 }
 0x2fc   :  { %v370_v7 = vpop.f32.mrf.mxu2  ;;  %v384_v8 = vpop.f32.mrf.mxu3 }
 0x2fd   :  { %v399_v9 = vadd.f32 %v395_v6, %v384_v8 }
 0x2fe   :  { %v2223_v10 = vpop.eup %2222 }
 0x2ff   :  { %2224 = vtanh.f32 %v399_v9  ;;  %446 = vrot.lane.b32.xlu1 %v2223_v10, %s2351_s3  ;;  %v1992_v14 = vmul.f32 -1.442695, %v399_v9 }
 0x301   :  { %2226 = vpow2.f32 %v1992_v14 }
 0x305   :  { %v2225_v13 = vpop.eup %2224 }
 0x306   :  { %448 = vrot.lane.b32.xlu2 %v2225_v13, %s2351_s3 }
 0x307   :  { %v2227_v15 = vpop.eup %2226 }
 0x308   :  { %v409_v16 = vadd.f32 1.0, %v2227_v15 }
 0x30a   :  { %2228 = vrcp.f32 %v409_v16  ;;  %v436_v31 = vand.u32 2147483648, %v409_v16  ;;  %vm430_vm12 = vweird.f32 %v409_v16  ;;  %v434_v33 = vand.u32 2147483647, %v409_v16 }
 0x30b   :  { %2230 = vpow2.f32 %v1991_v17 }
 0x30c   :  { %v437_v40 = vor.u32 1.1754944e-38, %v436_v31  ;;  %vm435_vm14 = vcmp.eq.f32.partialorder %v434_v33, 8.507059e+37 }
 0x310   :  { %v2229_v21 = vpop.eup %2228 }
 0x311   :  { %v426_v24 = vmul.f32 %v2229_v21, %v409_v16  ;;  %v2231_v25 = vpop.eup %2230  ;;  %vm431_vm11 = vweird.f32 %v2229_v21 }
 0x312   :  { %v408_v26 = vadd.f32 1.0, %v2231_v25  ;;  %vm432_vm13 = vmor %vm430_vm12, %vm431_vm11 }
 0x313   :  { %v427_v27 = vsub.f32 1.0, %v426_v24 }
 0x314   :  { %2232 = vrcp.f32 %v408_v26  ;;  %v421_v50 = vand.u32 2147483648, %v408_v26  ;;  %vm415_vm2 = vweird.f32 %v408_v26  ;;  %v419_v51 = vand.u32 2147483647, %v408_v26 }
 0x315   :  { %v428_v28 = vmul.f32 %v2229_v21, %v427_v27 }
 0x316   :  { %v422_v53 = vor.u32 1.1754944e-38, %v421_v50  ;;  %vm420_vm4 = vcmp.eq.f32.partialorder %v419_v51, 8.507059e+37 }
 0x317   :  { %v429_v29 = vadd.f32 %v2229_v21, %v428_v28 }
 0x319   :  { %v433_v34 = vsel %vm432_vm13, %v2229_v21, %v429_v29 }
 0x31a   :  { %v2233_v32 = vpop.eup %2232  ;;  %v438_v45 = vsel %vm435_vm14, %v437_v40, %v433_v34 }
 0x31b   :  { %v411_v41 = vmul.f32 %v2233_v32, %v408_v26  ;;  %vm416_vm15 = vweird.f32 %v2233_v32  ;;  %v443_v57 = vmul.f32 %v438_v45, %v2529_v44  ;;  %v2155_v44 = vld [vmem:[%s2978_s0 + $0x10] sm:$0xff] }
 0x31c   :  { %vm417_vm3 = vmor %vm415_vm2, %vm416_vm15  ;;  %1963 = vmatmul.msk.bf16.gmra.mxu0 %vm98_vm0, %v2155_v44  ;;  %1968 = vmatmul.msk.bf16.gmra.mxu1 %vm98_vm0, %v2155_v44 }
 0x31d   :  { %v412_v47 = vsub.f32 1.0, %v411_v41 }
 0x31f   :  { %v413_v48 = vmul.f32 %v2233_v32, %v412_v47 }
 0x321   :  { %v414_v49 = vadd.f32 %v2233_v32, %v413_v48 }
 0x323   :  { %v418_v52 = vsel %vm417_vm3, %v2233_v32, %v414_v49 }
 0x324   :  { %v423_v55 = vsel %vm420_vm4, %v422_v53, %v418_v52 }
 0x325   :  { %v442_v61 = vmul.f32 %v423_v55, %v2526_v36 }
 0x360   :  { %v449_v42 = vpop.permute.xlu2 %448 }
 0x361   :  { %v453_v46 = vmul.f32 %v449_v42, %v438_v45 }
 0x363   :  { %458 = vrot.lane.b32.xlu1 %v453_v46, %s2351_s3 }
 0x371   :  { %v447_v54 = vpop.permute.xlu1 %446 }
 0x372   :  { %v452_v56 = vmul.f32 %v447_v54, %v423_v55 }
 0x374   :  { %456 = vrot.lane.b32.xlu0 %v452_v56, %s2351_s3 }
 0x399   :  { %v133_v6 = vpop.f32.mrf.mxu0  ;;  %v167_v7 = vpop.f32.mrf.mxu1 }
 0x39a   :  { %v134_v8 = vadd.f32 %v133_v6, %v2496_v22  ;;  %v168_v9 = vadd.f32 %v167_v7, %v2498_v23 }
 0x39c   :  { %v186_v10 = vpack.c.bf16 %v168_v9, %v134_v8 }
 0x39e   :  { %v516_v15 = vunpack.c.l.bf16 %v186_v10  ;;  %v517_v16 = vunpack.c.h.bf16 %v186_v10 }
 0x3a1   :  { %v135_v13 = vpop.f32.mrf.mxu0  ;;  %v169_v14 = vpop.f32.mrf.mxu1 }
 0x3a2   :  { %v136_v17 = vadd.f32 %v135_v13, %v2496_v22 }
 0x3d5   :  { %v459_v58 = vpop.permute.xlu1 %458 }
 0x3d6   :  { %v2557_v59 = vadd.f32 %v459_v58, %v443_v57 }
 0x3d8   :  { %2234 = vtanh.f32 %v2557_v59 }
 0x3de   :  { %v2235_v60 = vpop.eup %2234 }
 0x3df   :  { %470 = vrot.lane.b32.xlu0 %v2235_v60, %s2351_s3 }
 0x3e6   :  { %v457_v62 = vpop.permute.xlu0 %456 }
 0x3e7   :  { %v2562_v63 = vadd.f32 %v457_v62, %v442_v61 }
 0x3e9   :  { %2236 = vtanh.f32 %v2562_v63 }
 0x3ef   :  { %v2237_v0 = vpop.eup %2236 }
 0x3f0   :  { %468 = vrot.lane.b32.xlu2 %v2237_v0, %s2351_s3 }
 0x44a   :  { %v469_v1 = vpop.permute.xlu2 %468 }
 0x44b   :  { %v474_v3 = vmul.f32 %v469_v1, %v423_v55 }
 0x451   :  { %v471_v2 = vpop.permute.xlu0 %470 }
 0x452   :  { %v475_v36 = vmul.f32 %v471_v2, %v438_v45 }
 0x454   :  { %v476_v4 = vpack.c.bf16 %v475_v36, %v474_v3 }
 0x456   :  { %478 = vrot.lane.b32.xlu1 %v476_v4, %s2352_s21 }
 0x4c8   :  { %v479_v5 = vpop.permute.xlu1 %478 }
 0x4c9   :  { %1993 = vmatmul.msk.bf16.vlgmr.msrb.gmra.mxu2 %vm231_vm10, %v479_v5  ;;  %1994 = vmatmul.msk.bf16.vlgmr.msrb.gmra.mxu3 %vm231_vm10, %v479_v5 }
 0x4ca   :  { %737 = vmatpush.bf16.msrb.mxu2 %v2452_v11  ;;  %751 = vmatpush.bf16.msrb.mxu3 %v2454_v12  ;;  %v170_v11 = vadd.f32 %v169_v14, %v2498_v23 }
 0x4ce   :  { %738 = vmatpush.bf16.msrb.mxu2 %v2473_v18  ;;  %752 = vmatpush.bf16.msrb.mxu3 %v2475_v19  ;;  %v187_v19 = vpack.c.bf16 %v170_v11, %v136_v17 }
 0x4d0   :  { %v519_v26 = vunpack.c.h.bf16 %v187_v19 }
 0x54c   :  { %v492_v12 = vpop.f32.mrf.mxu2  ;;  %v506_v21 = vpop.f32.mrf.mxu3 }
 0x54d   :  { %v520_v18 = vadd.f32 %v516_v15, %v492_v12  ;;  %v521_v24 = vadd.f32 %v517_v16, %v506_v21 }
 0x54f   :  { %v524_v25 = vsel %vm209_vm1, %v520_v18, %v521_v24 }
 0x550   :  { %2238 = vtanh.f32 %v524_v25  ;;  %v1995_v33 = vmul.f32 -1.442695, %v524_v25 }
 0x554   :  { %v494_v27 = vpop.f32.mrf.mxu2  ;;  %v508_v28 = vpop.f32.mrf.mxu3 }
 0x555   :  { %v523_v29 = vadd.f32 %v519_v26, %v508_v28 }
 0x556   :  { %v2239_v31 = vpop.eup %2238 }
 0x557   :  { %2240 = vtanh.f32 %v523_v29  ;;  %570 = vrot.lane.b32.xlu2 %v2239_v31, %s2351_s3  ;;  %v1996_v46 = vmul.f32 -1.442695, %v523_v29 }
 0x558   :  { %2242 = vpow2.f32 %v1995_v33 }
 0x55d   :  { %v2241_v32 = vpop.eup %2240 }
 0x55e   :  { %572 = vrot.lane.b32.xlu0 %v2241_v32, %s2351_s3  ;;  %v2243_v34 = vpop.eup %2242 }
 0x55f   :  { %v532_v40 = vadd.f32 1.0, %v2243_v34 }
 0x561   :  { %2244 = vrcp.f32 %v532_v40  ;;  %v545_v49 = vand.u32 2147483648, %v532_v40  ;;  %vm539_vm6 = vweird.f32 %v532_v40  ;;  %v543_v50 = vand.u32 2147483647, %v532_v40 }
 0x562   :  { %2246 = vpow2.f32 %v1996_v46 }
 0x563   :  { %v546_v53 = vor.u32 1.1754944e-38, %v545_v49  ;;  %vm544_vm8 = vcmp.eq.f32.partialorder %v543_v50, 8.507059e+37 }
 0x567   :  { %v2245_v41 = vpop.eup %2244 }
 0x568   :  { %v535_v42 = vmul.f32 %v2245_v41, %v532_v40  ;;  %vm540_vm5 = vweird.f32 %v2245_v41  ;;  %v2247_v51 = vpop.eup %2246 }
 0x569   :  { %vm541_vm7 = vmor %vm539_vm6, %vm540_vm5  ;;  %v533_v54 = vadd.f32 1.0, %v2247_v51 }
 0x56a   :  { %v536_v45 = vsub.f32 1.0, %v535_v42 }
 0x56b   :  { %2248 = vrcp.f32 %v533_v54  ;;  %v560_v44 = vand.u32 2147483648, %v533_v54  ;;  %vm554_vm11 = vweird.f32 %v533_v54  ;;  %v558_v1 = vand.u32 2147483647, %v533_v54 }
 0x56c   :  { %v537_v47 = vmul.f32 %v2245_v41, %v536_v45 }
 0x56d   :  { %v561_v3 = vor.u32 1.1754944e-38, %v560_v44  ;;  %vm559_vm13 = vcmp.eq.f32.partialorder %v558_v1, 8.507059e+37 }
 0x56e   :  { %v538_v48 = vadd.f32 %v2245_v41, %v537_v47 }
 0x570   :  { %v542_v52 = vsel %vm541_vm7, %v2245_v41, %v538_v48 }
 0x571   :  { %v547_v56 = vsel %vm544_vm8, %v546_v53, %v542_v52  ;;  %v2249_v58 = vpop.eup %2248 }
 0x572   :  { %v550_v60 = vmul.f32 %v2249_v58, %v533_v54  ;;  %vm555_vm9 = vweird.f32 %v2249_v58  ;;  %v566_v6 = vmul.f32 %v547_v56, %v2562_v63  ;;  %v2156_v63 = vld [vmem:[%s2978_s0 + $0x18] sm:$0xff] }
 0x573   :  { %vm556_vm12 = vmor %vm554_vm11, %vm555_vm9  ;;  %1964 = vmatmul.msk.bf16.gmra.mxu0 %vm98_vm0, %v2156_v63  ;;  %1969 = vmatmul.msk.bf16.gmra.mxu1 %vm98_vm0, %v2156_v63 }
 0x574   :  { %v551_v61 = vsub.f32 1.0, %v550_v60 }
 0x576   :  { %v552_v62 = vmul.f32 %v2249_v58, %v551_v61 }
 0x578   :  { %v553_v0 = vadd.f32 %v2249_v58, %v552_v62 }
 0x57a   :  { %v557_v2 = vsel %vm556_vm12, %v2249_v58, %v553_v0 }
 0x57b   :  { %v562_v4 = vsel %vm559_vm13, %v561_v3, %v557_v2 }
 0x57c   :  { %v567_v9 = vmul.f32 %v562_v4, %v2557_v59 }
 0x5b1   :  { %v571_v55 = vpop.permute.xlu2 %570 }
 0x5b2   :  { %v576_v57 = vmul.f32 %v571_v55, %v547_v56 }
 0x5b4   :  { %580 = vrot.lane.b32.xlu1 %v576_v57, %s2351_s3 }
 0x5d0   :  { %v573_v36 = vpop.permute.xlu0 %572 }
 0x5d1   :  { %v577_v5 = vmul.f32 %v573_v36, %v562_v4 }
 0x5d3   :  { %582 = vrot.lane.b32.xlu2 %v577_v5, %s2351_s3 }
 0x5f0   :  { %v138_v18 = vpop.f32.mrf.mxu0  ;;  %v172_v24 = vpop.f32.mrf.mxu1 }
 0x5f1   :  { %v139_v19 = vadd.f32 %v138_v18, %v2496_v22  ;;  %v173_v25 = vadd.f32 %v172_v24, %v2498_v23 }
 0x5f3   :  { %v188_v26 = vpack.c.bf16 %v173_v25, %v139_v19 }
 0x5f5   :  { %v640_v29 = vunpack.c.l.bf16 %v188_v26  ;;  %v641_v31 = vunpack.c.h.bf16 %v188_v26 }
 0x5f8   :  { %v140_v27 = vpop.f32.mrf.mxu0  ;;  %v174_v28 = vpop.f32.mrf.mxu1 }
 0x5f9   :  { %v141_v32 = vadd.f32 %v140_v27, %v2496_v22  ;;  %v175_v33 = vadd.f32 %v174_v28, %v2498_v23 }
 0x5fb   :  { %v189_v45 = vpack.c.bf16 %v175_v33, %v141_v32 }
 0x5fd   :  { %v643_v47 = vunpack.c.h.bf16 %v189_v45 }
 0x626   :  { %v581_v7 = vpop.permute.xlu1 %580 }
 0x627   :  { %v2589_v8 = vadd.f32 %v581_v7, %v566_v6 }
 0x629   :  { %2250 = vtanh.f32 %v2589_v8 }
 0x62d   :  { %v583_v10 = vpop.permute.xlu2 %582 }
 0x62e   :  { %v2593_v13 = vadd.f32 %v583_v10, %v567_v9 }
 0x62f   :  { %v2251_v14 = vpop.eup %2250 }
 0x630   :  { %2252 = vtanh.f32 %v2593_v13  ;;  %592 = vrot.lane.b32.xlu0 %v2251_v14, %s2351_s3 }
 0x636   :  { %v2253_v15 = vpop.eup %2252 }
 0x637   :  { %594 = vrot.lane.b32.xlu1 %v2253_v15, %s2351_s3 }
 0x6a2   :  { %v593_v59 = vpop.permute.xlu0 %592 }
 0x6a3   :  { %v598_v17 = vmul.f32 %v593_v59, %v547_v56 }
 0x6a9   :  { %v595_v16 = vpop.permute.xlu1 %594 }
 0x6aa   :  { %v599_v11 = vmul.f32 %v595_v16, %v562_v4 }
 0x6ac   :  { %v600_v12 = vpack.c.bf16 %v599_v11, %v598_v17 }
 0x6ae   :  { %602 = vrot.lane.b32.xlu2 %v600_v12, %s2352_s21 }
 0x708   :  { %v603_v21 = vpop.permute.xlu2 %602 }
 0x709   :  { %1997 = vmatmul.msk.bf16.vlgmr.msra.gmra.mxu2 %vm231_vm10, %v603_v21  ;;  %1998 = vmatmul.msk.bf16.vlgmr.msra.gmra.mxu3 %vm231_vm10, %v603_v21 }
 0x78c   :  { %v616_v34 = vpop.f32.mrf.mxu2  ;;  %v630_v40 = vpop.f32.mrf.mxu3 }
 0x78d   :  { %v644_v41 = vadd.f32 %v640_v29, %v616_v34  ;;  %v645_v42 = vadd.f32 %v641_v31, %v630_v40  ;;  %v765_v34 = vunpack.c.h.bf16 %v2502_v30 }
 0x78f   :  { %v648_v46 = vsel %vm209_vm1, %v644_v41, %v645_v42 }
 0x790   :  { %2254 = vtanh.f32 %v648_v46  ;;  %v1999_v23 = vmul.f32 -1.442695, %v648_v46 }
 0x794   :  { %v618_v48 = vpop.f32.mrf.mxu2  ;;  %v632_v49 = vpop.f32.mrf.mxu3 }
 0x795   :  { %v647_v50 = vadd.f32 %v643_v47, %v632_v49  ;;  %v767_v47 = vunpack.c.h.bf16 %v191_v39 }
 0x796   :  { %v2255_v51 = vpop.eup %2254 }
 0x797   :  { %2256 = vtanh.f32 %v647_v50  ;;  %694 = vrot.lane.b32.xlu0 %v2255_v51, %s2351_s3  ;;  %v2000_v52 = vmul.f32 -1.442695, %v647_v50 }
 0x798   :  { %2258 = vpow2.f32 %v1999_v23 }
 0x799   :  { %2260 = vpow2.f32 %v2000_v52 }
 0x79d   :  { %v2257_v22 = vpop.eup %2256 }
 0x79e   :  { %696 = vrot.lane.b32.xlu1 %v2257_v22, %s2351_s3  ;;  %v2259_v53 = vpop.eup %2258 }
 0x79f   :  { %v656_v54 = vadd.f32 1.0, %v2259_v53  ;;  %v2261_v55 = vpop.eup %2260 }
 0x7a0   :  { %v657_v56 = vadd.f32 1.0, %v2261_v55 }
 0x7a1   :  { %2262 = vrcp.f32 %v656_v54  ;;  %v669_v2 = vand.u32 2147483648, %v656_v54  ;;  %vm663_vm14 = vweird.f32 %v656_v54  ;;  %v667_v3 = vand.u32 2147483647, %v656_v54 }
 0x7a2   :  { %2264 = vrcp.f32 %v657_v56  ;;  %v684_v14 = vand.u32 2147483648, %v657_v56  ;;  %vm678_vm4 = vweird.f32 %v657_v56  ;;  %v682_v15 = vand.u32 2147483647, %v657_v56 }
 0x7a3   :  { %v670_v5 = vor.u32 1.1754944e-38, %v669_v2  ;;  %vm668_vm2 = vcmp.eq.f32.partialorder %v667_v3, 8.507059e+37 }
 0x7a4   :  { %v685_v59 = vor.u32 1.1754944e-38, %v684_v14  ;;  %vm683_vm6 = vcmp.eq.f32.partialorder %v682_v15, 8.507059e+37 }
 0x7a7   :  { %v2263_v57 = vpop.eup %2262 }
 0x7a8   :  { %v659_v58 = vmul.f32 %v2263_v57, %v656_v54  ;;  %v2265_v60 = vpop.eup %2264  ;;  %vm664_vm0 = vweird.f32 %v2263_v57 }
 0x7a9   :  { %v674_v62 = vmul.f32 %v2265_v60, %v657_v56  ;;  %vm665_vm15 = vmor %vm663_vm14, %vm664_vm0  ;;  %vm679_vm3 = vweird.f32 %v2265_v60  ;;  %vm853_vm14 = vcmask 1041408  }
 0x7aa   :  { %v660_v61 = vsub.f32 1.0, %v659_v58  ;;  %vm680_vm5 = vmor %vm678_vm4, %vm679_vm3  ;;  %vm923_vm3 = vcmask 523264  }
 0x7ab   :  { %v675_v44 = vsub.f32 1.0, %v674_v62 }
 0x7ac   :  { %v661_v0 = vmul.f32 %v2263_v57, %v660_v61 }
 0x7ad   :  { %v676_v36 = vmul.f32 %v2265_v60, %v675_v44 }
 0x7ae   :  { %v662_v1 = vadd.f32 %v2263_v57, %v661_v0 }
 0x7af   :  { %v677_v9 = vadd.f32 %v2265_v60, %v676_v36 }
 0x7b0   :  { %v666_v4 = vsel %vm665_vm15, %v2263_v57, %v662_v1  ;;  %vm864_vm15 = vcmask 1040384  }
 0x7b1   :  { %v671_v7 = vsel %vm668_vm2, %v670_v5, %v666_v4  ;;  %v681_v63 = vsel %vm680_vm5, %v2265_v60, %v677_v9  ;;  %vm866_vm2 = vcmask 1046528  }
 0x7b2   :  { %v686_v17 = vsel %vm683_vm6, %v685_v59, %v681_v63  ;;  %v690_v12 = vmul.f32 %v671_v7, %v2589_v8 }
 0x7b3   :  { %v691_v19 = vmul.f32 %v686_v17, %v2593_v13  ;;  %v764_v13 = vunpack.c.l.bf16 %v2502_v30 }
 0x809   :  { %v695_v6 = vpop.permute.xlu0 %694 }
 0x80a   :  { %v700_v10 = vmul.f32 %v695_v6, %v671_v7 }
 0x80c   :  { %704 = vrot.lane.b32.xlu2 %v700_v10, %s2351_s3 }
 0x810   :  { %v697_v16 = vpop.permute.xlu1 %696 }
 0x811   :  { %v701_v11 = vmul.f32 %v697_v16, %v686_v17 }
 0x813   :  { %706 = vrot.lane.b32.xlu0 %v701_v11, %s2351_s3 }
 0x866   :  { %v705_v21 = vpop.permute.xlu2 %704 }
 0x867   :  { %v2617_v18 = vadd.f32 %v705_v21, %v690_v12 }
 0x869   :  { %2266 = vtanh.f32 %v2617_v18 }
 0x86f   :  { %v2267_v24 = vpop.eup %2266 }
 0x870   :  { %716 = vrot.lane.b32.xlu1 %v2267_v24, %s2351_s3 }
 0x885   :  { %v707_v25 = vpop.permute.xlu0 %706 }
 0x886   :  { %v2622_v26 = vadd.f32 %v707_v25, %v691_v19  ;;  %v2031_v19 = vld [vmem:[%s2981_s4 + $0x30] sm:$0xf]  ;;  %v2171_v25 = vld [vmem:[%s2981_s4 + $0x34] sm:$0xf0] }
 0x888   :  { %2268 = vtanh.f32 %v2622_v26 }
 0x88e   :  { %v2269_v27 = vpop.eup %2268 }
 0x88f   :  { %718 = vrot.lane.b32.xlu2 %v2269_v27, %s2351_s3  ;;  %v2032_v27 = vor.u32 %v2171_v25, %v2031_v19 }
 0x891   :  { %931 = vmatpush.bf16.msrb.mxu0 %v2032_v27 }
 0x8e2   :  { %v717_v28 = vpop.permute.xlu1 %716 }
 0x8e3   :  { %v722_v29 = vmul.f32 %v717_v28, %v671_v7  ;;  %v2023_v28 = vld [vmem:[%s2981_s4 + $0x20] sm:$0xf] }
 0x8e9   :  { %v719_v8 = vpop.permute.xlu2 %718 }
 0x8ea   :  { %v723_v31 = vmul.f32 %v719_v8, %v686_v17  ;;  %v2169_v8 = vld [vmem:[%s2981_s4 + $0x24] sm:$0xf0] }
 0x8ec   :  { %v724_v32 = vpack.c.bf16 %v723_v31, %v722_v29  ;;  %v2168_v31 = vld [vmem:[%s2981_s4 + $0x24] sm:$0xf] }
 0x8ee   :  { %726 = vrot.lane.b32.xlu0 %v724_v32, %s2352_s21  ;;  %v2025_v32 = vld [vmem:[%s2981_s4 + $0x28] sm:$0xf0] }
 0x960   :  { %v727_v33 = vpop.permute.xlu0 %726 }
 0x961   :  { %2001 = vmatmul.msk.bf16.vlgmr.msrb.gmra.mxu2 %vm231_vm10, %v727_v33  ;;  %2002 = vmatmul.msk.bf16.vlgmr.msrb.gmra.mxu3 %vm231_vm10, %v727_v33  ;;  %v2024_v33 = vor.u32 %v2169_v8, %v2023_v28 }
 0x963   :  { %932 = vmatpush.bf16.msrb.mxu0 %v2024_v33 }
 0x9e4   :  { %v740_v40 = vpop.f32.mrf.mxu2  ;;  %v754_v41 = vpop.f32.mrf.mxu3 }
 0x9e5   :  { %v768_v42 = vadd.f32 %v764_v13, %v740_v40  ;;  %v769_v45 = vadd.f32 %v765_v34, %v754_v41  ;;  %v2028_v13 = vor.u32 %v2168_v31, %v2025_v32  ;;  %v2015_v34 = vld [vmem:[%s2981_s4 + $0x10] sm:$0xf]  ;;  %v2167_v40 = vld [vmem:[%s2981_s4 + $0x14] sm:$0xf0]  ;;  %v2166_v41 = vld [vmem:[%s2981_s4 + $0x14] sm:$0xf] }
 0x9e7   :  { %v772_v46 = vsel %vm209_vm1, %v768_v42, %v769_v45  ;;  %v2017_v42 = vld [vmem:[%s2981_s4 + $0x18] sm:$0xf0]  ;;  %v2016_v45 = vor.u32 %v2167_v40, %v2015_v34 }
 0x9e8   :  { %2270 = vtanh.f32 %v772_v46  ;;  %v2003_v52 = vmul.f32 -1.442695, %v772_v46  ;;  %v2020_v46 = vor.u32 %v2166_v41, %v2017_v42 }
 0x9e9   :  { %933 = vmatpush.bf16.msrb.mxu0 %v2016_v45 }
 0x9ec   :  { %v742_v48 = vpop.f32.mrf.mxu2  ;;  %v756_v49 = vpop.f32.mrf.mxu3 }
 0x9ed   :  { %v771_v50 = vadd.f32 %v767_v47, %v756_v49 }
 0x9ee   :  { %v2271_v51 = vpop.eup %2270 }
 0x9ef   :  { %2272 = vtanh.f32 %v771_v50  ;;  %818 = vrot.lane.b32.xlu1 %v2271_v51, %s2351_s3  ;;  %v2004_v22 = vmul.f32 -1.442695, %v771_v50 }
 0x9f1   :  { %2274 = vpow2.f32 %v2004_v22 }
 0x9f5   :  { %v2273_v30 = vpop.eup %2272 }
 0x9f6   :  { %820 = vrot.lane.b32.xlu2 %v2273_v30, %s2351_s3 }
 0x9f7   :  { %v2275_v23 = vpop.eup %2274 }
 0x9f8   :  { %v781_v43 = vadd.f32 1.0, %v2275_v23  ;;  %v2007_v23 = vld [vmem:[%s2981_s4] sm:$0xf] }
 0x9fa   :  { %2276 = vrcp.f32 %v781_v43  ;;  %v808_v57 = vand.u32 2147483648, %v781_v43  ;;  %vm802_vm7 = vweird.f32 %v781_v43  ;;  %v806_v60 = vand.u32 2147483647, %v781_v43 }
 0x9fb   :  { %2278 = vpow2.f32 %v2003_v52  ;;  %v2164_v52 = vld [vmem:[%s2981_s4 + $0x4] sm:$0xf] }
 0x9fc   :  { %v809_v62 = vor.u32 1.1754944e-38, %v808_v57  ;;  %vm807_vm9 = vcmp.eq.f32.partialorder %v806_v60, 8.507059e+37  ;;  %v2051_v57 = vld [vmem:[%s2982_s5 + $0x18] sm:$0xf0]  ;;  %v2041_v60 = vld [vmem:[%s2982_s5] sm:$0xf] }
 0xa00   :  { %v2277_v53 = vpop.eup %2276 }
 0xa01   :  { %v798_v35 = vmul.f32 %v2277_v53, %v781_v43  ;;  %v2279_v38 = vpop.eup %2278  ;;  %vm803_vm1 = vweird.f32 %v2277_v53  ;;  %v2165_v43 = vld [vmem:[%s2981_s4 + $0x4] sm:$0xf0] }
 0xa02   :  { %v780_v39 = vadd.f32 1.0, %v2279_v38  ;;  %vm804_vm8 = vmor %vm802_vm7, %vm803_vm1  ;;  %v2049_v38 = vld [vmem:[%s2982_s5 + $0x10] sm:$0xf] }
 0xa03   :  { %v799_v54 = vsub.f32 1.0, %v798_v35  ;;  %v2009_v35 = vld [vmem:[%s2981_s4 + $0x8] sm:$0xf0] }
 0xa04   :  { %2280 = vrcp.f32 %v780_v39  ;;  %v793_v5 = vand.u32 2147483648, %v780_v39  ;;  %vm787_vm12 = vweird.f32 %v780_v39  ;;  %v791_v6 = vand.u32 2147483647, %v780_v39 }
 0xa05   :  { %v800_v55 = vmul.f32 %v2277_v53, %v799_v54  ;;  %v2012_v54 = vor.u32 %v2164_v52, %v2009_v35 }
 0xa06   :  { %v794_v9 = vor.u32 1.1754944e-38, %v793_v5  ;;  %vm792_vm0 = vcmp.eq.f32.partialorder %v791_v6, 8.507059e+37 }
 0xa07   :  { %v801_v56 = vadd.f32 %v2277_v53, %v800_v55 }
 0xa09   :  { %v805_v61 = vsel %vm804_vm8, %v2277_v53, %v801_v56  ;;  %v2008_v53 = vor.u32 %v2165_v43, %v2007_v23  ;;  %v2174_v56 = vld [vmem:[%s2982_s5 + $0x14] sm:$0xf] }
 0xa0a   :  { %v2281_v58 = vpop.eup %2280  ;;  %v810_v1 = vsel %vm807_vm9, %v809_v62, %v805_v61  ;;  %v2173_v61 = vld [vmem:[%s2982_s5 + $0x4] sm:$0xf0]  ;;  %v2172_v62 = vld [vmem:[%s2982_s5 + $0x4] sm:$0xf] }
 0xa0b   :  { %v783_v0 = vmul.f32 %v2281_v58, %v780_v39  ;;  %vm788_vm11 = vweird.f32 %v2281_v58  ;;  %v815_v63 = vmul.f32 %v810_v1, %v2622_v26  ;;  %v2170_v26 = vld [vmem:[%s2981_s4 + $0x34] sm:$0xf]  ;;  %v2175_v39 = vld [vmem:[%s2982_s5 + $0x14] sm:$0xf0]  ;;  %934 = vmatpush.bf16.msrb.mxu0 %v2008_v53 }
 0xa0c   :  { %vm789_vm13 = vmor %vm787_vm12, %vm788_vm11  ;;  %v2700_v55 = vor.u32 %v2175_v39, %v2049_v38 }
 0xa0d   :  { %v784_v3 = vsub.f32 1.0, %v783_v0  ;;  %v2723_v0 = vor.u32 %v2173_v61, %v2041_v60 }
 0xa0e   :  { %993 = vmatpush.bf16.msra.mxu2 %v2700_v55 }
 0xa0f   :  { %v785_v36 = vmul.f32 %v2281_v58, %v784_v3  ;;  %1074 = vmatpush.bf16.msra.mxu0 %v2700_v55 }
 0xa11   :  { %v786_v4 = vadd.f32 %v2281_v58, %v785_v36 }
 0xa12   :  { %994 = vmatpush.bf16.msra.mxu2 %v2723_v0 }
 0xa13   :  { %v790_v7 = vsel %vm789_vm13, %v2281_v58, %v786_v4  ;;  %v2708_v58 = vor.u32 %v2174_v56, %v2051_v57  ;;  %1075 = vmatpush.bf16.msra.mxu0 %v2723_v0 }
 0xa14   :  { %v795_v14 = vsel %vm792_vm0, %v794_v9, %v790_v7 }
 0xa15   :  { %v814_v11 = vmul.f32 %v795_v14, %v2617_v18  ;;  %v2033_v18 = vld [vmem:[%s2981_s4 + $0x38] sm:$0xf0]  ;;  %1006 = vmatpush.bf16.msra.mxu3 %v2708_v58  ;;  %995 = vmatmul.bf16.vlgmr.msra.gmra.mxu2 %v2350_v20 }
 0xa16   :  { %v2036_v29 = vor.u32 %v2170_v26, %v2033_v18  ;;  %1156 = vmatpush.bf16.msrb.mxu2 %v2700_v55 }
 0xa18   :  { %944 = vmatpush.bf16.msrb.mxu1 %v2036_v29 }
 0xa1a   :  { %1157 = vmatpush.bf16.msrb.mxu2 %v2723_v0 }
 0xa1c   :  { %945 = vmatpush.bf16.msrb.mxu1 %v2028_v13 }
 0xa1e   :  { %1320 = vmatpush.bf16.msra.mxu2 %v2700_v55 }
 0xa20   :  { %946 = vmatpush.bf16.msrb.mxu1 %v2020_v46 }
 0xa22   :  { %1321 = vmatpush.bf16.msra.mxu2 %v2723_v0 }
 0xa24   :  { %947 = vmatpush.bf16.msrb.mxu1 %v2012_v54 }
 0xa28   :  { %1087 = vmatpush.bf16.msra.mxu1 %v2708_v58 }
 0xa50   :  { %v821_v44 = vpop.permute.xlu2 %820 }
 0xa51   :  { %v825_v2 = vmul.f32 %v821_v44, %v810_v1  ;;  %v2043_v44 = vld [vmem:[%s2982_s5 + $0x8] sm:$0xf0] }
 0xa53   :  { %830 = vrot.lane.b32.xlu1 %v825_v2, %s2351_s3 }
 0xa61   :  { %v819_v10 = vpop.permute.xlu1 %818 }
 0xa62   :  { %v824_v15 = vmul.f32 %v819_v10, %v795_v14 }
 0xa64   :  { %828 = vrot.lane.b32.xlu0 %v824_v15, %s2351_s3  ;;  %v877_v15 = vld [vmem:[%s2983_s6] sm:$0x3] }
 0xa98   :  { %v996_v7 = vpop.f32.mrf.mxu2 }
 0xaa0   :  { %v998_v10 = vpop.f32.mrf.mxu2 }
 0xac5   :  { %v831_v59 = vpop.permute.xlu1 %830 }
 0xac6   :  { %v835_v16 = vadd.f32 %v831_v59, %v815_v63  ;;  %v879_v63 = vperm.slane %v877_v15, 0  ;;  %v880_v59 = vperm.slane %v877_v15, 1 }
 0xac8   :  { %2282 = vtanh.f32 %v835_v16 }
 0xace   :  { %v2283_v17 = vpop.eup %2282 }
 0xacf   :  { %842 = vrot.lane.b32.xlu0 %v2283_v17, %s2351_s3 }
 0xad6   :  { %v829_v12 = vpop.permute.xlu0 %828 }
 0xad7   :  { %v834_v21 = vadd.f32 %v829_v12, %v814_v11 }
 0xad9   :  { %2284 = vtanh.f32 %v834_v21 }
 0xadf   :  { %v2285_v24 = vpop.eup %2284 }
 0xae0   :  { %840 = vrot.lane.b32.xlu2 %v2285_v24, %s2351_s3 }
 0xb3a   :  { %v841_v47 = vpop.permute.xlu2 %840 }
 0xb3b   :  { %v846_v48 = vmul.f32 %v841_v47, %v795_v14 }
 0xb3d   :  { %849 = vrot.lane.b32.xlu1 %v846_v48, %s2352_s21  ;;  %v854_v51 = vrot.slane %v846_v48, 6 }
 0xb41   :  { %v843_v49 = vpop.permute.xlu0 %842 }
 0xb42   :  { %v847_v50 = vmul.f32 %v843_v49, %v810_v1  ;;  %v2728_v1 = vor.u32 %v2172_v62, %v2043_v44 }
 0xb44   :  { %v855_v30 = vrot.slane %v847_v50, 6  ;;  %1007 = vmatpush.bf16.msra.mxu3 %v2728_v1  ;;  %1088 = vmatpush.bf16.msra.mxu1 %v2728_v1 }
 0xb46   :  { %v856_v22 = vsel %vm853_vm14, %v854_v51, %v855_v30 }
 0xb47   :  { %857 = vrot.lane.b32.xlu2 %v856_v22, %s2353_s29  ;;  %1008 = vmatmul.bf16.vlgmr.msra.gmra.mxu3 %v2350_v20 }
 0xb48   :  { %1169 = vmatpush.bf16.msrb.mxu3 %v2708_v58 }
 0xb4c   :  { %1170 = vmatpush.bf16.msrb.mxu3 %v2728_v1 }
 0xb50   :  { %1333 = vmatpush.bf16.msra.mxu3 %v2708_v58 }
 0xb54   :  { %1334 = vmatpush.bf16.msra.mxu3 %v2728_v1 }
 0xba1   :  { %v858_v2 = vpop.permute.xlu2 %857 }
 0xbaf   :  { %v850_v3 = vpop.permute.xlu1 %849 }
 0xbb0   :  { %v860_v36 = vsel %vm231_vm10, %v850_v3, %v858_v2 }
 0xbb1   :  { %v862_v4 = vrot.slane %v860_v36, 7 }
 0xbb3   :  { %v865_v20 = vsel %vm864_vm15, 0.0, %v862_v4 }
 0xbb4   :  { %v867_v5 = vsel %vm866_vm2, %v865_v20, 0.0 }
 0xbb5   :  { %v868_v6 = vpack.c.bf16 %v867_v5, %v867_v5 }
 0xbb7   :  { %2037 = vmatmul.msk.bf16.vlgmr.msrb.gmra.mxu0 %vm923_vm3, %v868_v6  ;;  %2038 = vmatmul.msk.bf16.vlgmr.msrb.gmra.mxu1 %vm923_vm3, %v868_v6 }
 0xbb8   :  { %1238 = vmatpush.bf16.msrb.mxu0 %v2700_v55  ;;  %1251 = vmatpush.bf16.msrb.mxu1 %v2708_v58 }
 0xbbc   :  { %1239 = vmatpush.bf16.msrb.mxu0 %v2723_v0  ;;  %1252 = vmatpush.bf16.msrb.mxu1 %v2728_v1 }
 0xbca   :  { %v1009_v9 = vpop.f32.mrf.mxu3 }
 0xbd2   :  { %v1011_v14 = vpop.f32.mrf.mxu3 }
 0xc34   :  { %v936_v16 = vpop.f32.mrf.mxu0  ;;  %v949_v17 = vpop.f32.mrf.mxu1 }
 0xc35   :  { %v937_v11 = vadd.f32 %v936_v16, %v879_v63  ;;  %v950_v12 = vadd.f32 %v949_v17, %v880_v59 }
 0xc37   :  { %953 = vst [vmem:[#allocation3] sm:$0xff] %v937_v11 }
 0xc38   :  { %954 = vst [vmem:[#allocation3 + $0x8] sm:$0xff] %v950_v12 }
 0xc3c   :  { %v938_v21 = vpop.f32.mrf.mxu0  ;;  %v951_v24 = vpop.f32.mrf.mxu1 }
 0xc3e   :  { %v1013_v19 = vld [vmem:[#allocation3] ss:$0 sm:$0xff]  ;;  %v1094_v39 = vld [vmem:[#allocation3 + $0x1] ss:$0 sm:$0xff] }
 0xc3f   :  { %v1015_v25 = vadd.f32 %v1013_v19, %v996_v7  ;;  %v1014_v26 = vld [vmem:[#allocation3 + $0xf] ss:$0 sm:$0xff]  ;;  %v1095_v56 = vld [vmem:[#allocation3 + $0xe] ss:$0 sm:$0xff] }
 0xc40   :  { %v1016_v27 = vadd.f32 %v1014_v26, %v1009_v9 }
 0xc42   :  { %v1017_v18 = vsel %vm864_vm15, %v1015_v25, %v1016_v27 }
 0xc43   :  { %v1018_v28 = vsel %vm853_vm14, %v1017_v18, 0.0 }
 0xc44   :  { %2286 = vtanh.f32 %v1018_v28  ;;  %v2055_v29 = vmul.f32 -1.442695, %v1018_v28 }
 0xc46   :  { %2288 = vpow2.f32 %v2055_v29 }
 0xc4a   :  { %v2287_v8 = vpop.eup %2286 }
 0xc4b   :  { %1041 = vrot.lane.b32.xlu0 %v2287_v8, %s2351_s3  ;;  %v1176_v8 = vld [vmem:[#allocation3 + $0x2] ss:$0 sm:$0xff] }
 0xc4c   :  { %v2289_v31 = vpop.eup %2288 }
 0xc4d   :  { %v1022_v32 = vadd.f32 1.0, %v2289_v31  ;;  %v1177_v31 = vld [vmem:[#allocation3 + $0xd] ss:$0 sm:$0xff] }
 0xc4f   :  { %2290 = vrcp.f32 %v1022_v32  ;;  %v1034_v42 = vand.u32 2147483648, %v1022_v32  ;;  %vm1028_vm5 = vweird.f32 %v1022_v32  ;;  %v1032_v45 = vand.u32 2147483647, %v1022_v32 }
 0xc51   :  { %v1035_v47 = vor.u32 1.1754944e-38, %v1034_v42  ;;  %vm1033_vm1 = vcmp.eq.f32.partialorder %v1032_v45, 8.507059e+37 }
 0xc55   :  { %v2291_v33 = vpop.eup %2290 }
 0xc56   :  { %v1024_v13 = vmul.f32 %v2291_v33, %v1022_v32  ;;  %vm1029_vm4 = vweird.f32 %v2291_v33 }
 0xc57   :  { %vm1030_vm6 = vmor %vm1028_vm5, %vm1029_vm4 }
 0xc58   :  { %v1025_v34 = vsub.f32 1.0, %v1024_v13 }
 0xc5a   :  { %v1026_v40 = vmul.f32 %v2291_v33, %v1025_v34 }
 0xc5c   :  { %v1027_v41 = vadd.f32 %v2291_v33, %v1026_v40 }
 0xc5e   :  { %v1031_v46 = vsel %vm1030_vm6, %v2291_v33, %v1027_v41 }
 0xc5f   :  { %v1036_v49 = vsel %vm1033_vm1, %v1035_v47, %v1031_v46 }
 0xc60   :  { %v1039_v51 = vmul.f32 0.0, %v1036_v49 }
 0xcbd   :  { %v1042_v48 = vpop.permute.xlu0 %1041 }
 0xcbe   :  { %v1044_v50 = vmul.f32 %v1042_v48, %v1036_v49 }
 0xcc0   :  { %1046 = vrot.lane.b32.xlu1 %v1044_v50, %s2351_s3 }
 0xd32   :  { %v1047_v30 = vpop.permute.xlu1 %1046 }
 0xd33   :  { %v1049_v22 = vadd.f32 %v1047_v30, %v1039_v51 }
 0xd35   :  { %2292 = vtanh.f32 %v1049_v22 }
 0xd3b   :  { %v2293_v23 = vpop.eup %2292 }
 0xd3c   :  { %1052 = vrot.lane.b32.xlu2 %v2293_v23, %s2351_s3 }
 0xd96   :  { %v1053_v43 = vpop.permute.xlu2 %1052 }
 0xd97   :  { %v2760_v52 = vmul.f32 %v1053_v43, %v1036_v49 }
 0xd99   :  { %v1061_v53 = vpack.c.bf16 %v2760_v52, %v2760_v52 }
 0xd9b   :  { %1063 = vrot.lane.b32.xlu0 %v1061_v53, %s2352_s21 }
 0xe0d   :  { %v1064_v35 = vpop.permute.xlu0 %1063 }
 0xe0e   :  { %2056 = vmatmul.msk.bf16.vlgmr.msra.gmra.mxu0 %vm231_vm10, %v1064_v35  ;;  %2057 = vmatmul.msk.bf16.vlgmr.msra.gmra.mxu1 %vm231_vm10, %v1064_v35 }
 0xe0f   :  { %1402 = vmatpush.bf16.msra.mxu0 %v2700_v55  ;;  %1415 = vmatpush.bf16.msra.mxu1 %v2708_v58 }
 0xe13   :  { %1403 = vmatpush.bf16.msra.mxu0 %v2723_v0  ;;  %1416 = vmatpush.bf16.msra.mxu1 %v2728_v1 }
 0xe8b   :  { %v1077_v38 = vpop.f32.mrf.mxu0  ;;  %v1090_v54 = vpop.f32.mrf.mxu1 }
 0xe8c   :  { %v1096_v57 = vadd.f32 %v1094_v39, %v1077_v38  ;;  %v1097_v60 = vadd.f32 %v1095_v56, %v1090_v54 }
 0xe8e   :  { %v1098_v61 = vsel %vm864_vm15, %v1096_v57, %v1097_v60 }
 0xe8f   :  { %v1099_v62 = vsel %vm853_vm14, %v1098_v61, 0.0 }
 0xe90   :  { %2294 = vtanh.f32 %v1099_v62  ;;  %v2058_v36 = vmul.f32 -1.442695, %v1099_v62 }
 0xe92   :  { %2296 = vpow2.f32 %v2058_v36  ;;  %v1258_v36 = vld [vmem:[#allocation3 + $0x3] ss:$0 sm:$0xff] }
 0xe93   :  { %v1079_v44 = vpop.f32.mrf.mxu0  ;;  %v1092_v2 = vpop.f32.mrf.mxu1 }
 0xe96   :  { %v2295_v3 = vpop.eup %2294 }
 0xe97   :  { %1122 = vrot.lane.b32.xlu1 %v2295_v3, %s2351_s3 }
 0xe98   :  { %v2297_v4 = vpop.eup %2296 }
 0xe99   :  { %v1103_v20 = vadd.f32 1.0, %v2297_v4 }
 0xe9b   :  { %2298 = vrcp.f32 %v1103_v20  ;;  %v1115_v14 = vand.u32 2147483648, %v1103_v20  ;;  %vm1109_vm8 = vweird.f32 %v1103_v20  ;;  %v1113_v15 = vand.u32 2147483647, %v1103_v20 }
 0xe9d   :  { %v1116_v59 = vor.u32 1.1754944e-38, %v1115_v14  ;;  %vm1114_vm11 = vcmp.eq.f32.partialorder %v1113_v15, 8.507059e+37 }
 0xea1   :  { %v2299_v5 = vpop.eup %2298 }
 0xea2   :  { %v1105_v6 = vmul.f32 %v2299_v5, %v1103_v20  ;;  %vm1110_vm7 = vweird.f32 %v2299_v5  ;;  %v1259_v20 = vld [vmem:[#allocation3 + $0xc] ss:$0 sm:$0xff] }
 0xea3   :  { %vm1111_vm9 = vmor %vm1109_vm8, %vm1110_vm7 }
 0xea4   :  { %v1106_v7 = vsub.f32 1.0, %v1105_v6 }
 0xea6   :  { %v1107_v9 = vmul.f32 %v2299_v5, %v1106_v7 }
 0xea8   :  { %v1108_v10 = vadd.f32 %v2299_v5, %v1107_v9 }
 0xeaa   :  { %v1112_v63 = vsel %vm1111_vm9, %v2299_v5, %v1108_v10 }
 0xeab   :  { %v1117_v17 = vsel %vm1114_vm11, %v1116_v59, %v1112_v63 }
 0xeac   :  { %v1120_v12 = vmul.f32 %v1117_v17, %v1049_v22 }
 0xf09   :  { %v1123_v16 = vpop.permute.xlu1 %1122 }
 0xf0a   :  { %v1125_v11 = vmul.f32 %v1123_v16, %v1117_v17 }
 0xf0c   :  { %1127 = vrot.lane.b32.xlu2 %v1125_v11, %s2351_s3 }
 0xf66   :  { %v1128_v21 = vpop.permute.xlu2 %1127 }
 0xf67   :  { %v1130_v24 = vadd.f32 %v1128_v21, %v1120_v12 }
 0xf69   :  { %2300 = vtanh.f32 %v1130_v24 }
 0xf6f   :  { %v2301_v19 = vpop.eup %2300 }
 0xf70   :  { %1133 = vrot.lane.b32.xlu0 %v2301_v19, %s2351_s3 }
 0xfe2   :  { %v1134_v25 = vpop.permute.xlu0 %1133 }
 0xfe3   :  { %v2776_v26 = vmul.f32 %v1134_v25, %v1117_v17 }
 0xfe5   :  { %v1143_v27 = vpack.c.bf16 %v2776_v26, %v2776_v26 }
 0xfe7   :  { %1145 = vrot.lane.b32.xlu1 %v1143_v27, %s2352_s21 }
0x1059   :  { %v1146_v18 = vpop.permute.xlu1 %1145 }
0x105a   :  { %2059 = vmatmul.msk.bf16.vlgmr.msrb.gmra.mxu2 %vm231_vm10, %v1146_v18  ;;  %2060 = vmatmul.msk.bf16.vlgmr.msrb.gmra.mxu3 %vm231_vm10, %v1146_v18 }
0x105b   :  { %1484 = vmatpush.bf16.msrb.mxu2 %v2700_v55  ;;  %1497 = vmatpush.bf16.msrb.mxu3 %v2708_v58 }
0x105f   :  { %1485 = vmatpush.bf16.msrb.mxu2 %v2723_v0  ;;  %1498 = vmatpush.bf16.msrb.mxu3 %v2728_v1 }
0x10dd   :  { %v1159_v28 = vpop.f32.mrf.mxu2  ;;  %v1172_v29 = vpop.f32.mrf.mxu3 }
0x10de   :  { %v1178_v32 = vadd.f32 %v1176_v8, %v1159_v28  ;;  %v1179_v33 = vadd.f32 %v1177_v31, %v1172_v29 }
0x10e0   :  { %v1180_v13 = vsel %vm864_vm15, %v1178_v32, %v1179_v33 }
0x10e1   :  { %v1181_v34 = vsel %vm853_vm14, %v1180_v13, 0.0 }
0x10e2   :  { %2302 = vtanh.f32 %v1181_v34  ;;  %v2061_v45 = vmul.f32 -1.442695, %v1181_v34 }
0x10e4   :  { %2304 = vpow2.f32 %v2061_v45 }
0x10e5   :  { %v1161_v40 = vpop.f32.mrf.mxu2  ;;  %v1174_v41 = vpop.f32.mrf.mxu3 }
0x10e6   :  { %v1340_v40 = vld [vmem:[#allocation3 + $0x4] ss:$0 sm:$0xff] }
0x10e8   :  { %v2303_v42 = vpop.eup %2302 }
0x10e9   :  { %1204 = vrot.lane.b32.xlu2 %v2303_v42, %s2351_s3  ;;  %v1341_v42 = vld [vmem:[#allocation3 + $0xb] ss:$0 sm:$0xff] }
0x10ea   :  { %v2305_v46 = vpop.eup %2304 }
0x10eb   :  { %v1185_v47 = vadd.f32 1.0, %v2305_v46 }
0x10ed   :  { %2306 = vrcp.f32 %v1185_v47  ;;  %v1197_v22 = vand.u32 2147483648, %v1185_v47  ;;  %vm1191_vm13 = vweird.f32 %v1185_v47  ;;  %v1195_v23 = vand.u32 2147483647, %v1185_v47 }
0x10ef   :  { %v1198_v53 = vor.u32 1.1754944e-38, %v1197_v22  ;;  %vm1196_vm2 = vcmp.eq.f32.partialorder %v1195_v23, 8.507059e+37 }
0x10f3   :  { %v2307_v48 = vpop.eup %2306 }
0x10f4   :  { %v1187_v49 = vmul.f32 %v2307_v48, %v1185_v47  ;;  %vm1192_vm12 = vweird.f32 %v2307_v48 }
0x10f5   :  { %vm1193_vm0 = vmor %vm1191_vm13, %vm1192_vm12 }
0x10f6   :  { %v1188_v50 = vsub.f32 1.0, %v1187_v49 }
0x10f8   :  { %v1189_v51 = vmul.f32 %v2307_v48, %v1188_v50 }
0x10fa   :  { %v1190_v30 = vadd.f32 %v2307_v48, %v1189_v51 }
0x10fc   :  { %v1194_v43 = vsel %vm1193_vm0, %v2307_v48, %v1190_v30 }
0x10fd   :  { %v1199_v38 = vsel %vm1196_vm2, %v1198_v53, %v1194_v43 }
0x10fe   :  { %v1202_v54 = vmul.f32 %v1199_v38, %v1130_v24 }
0x1143   :  { %v1205_v35 = vpop.permute.xlu2 %1204 }
0x1144   :  { %v1207_v39 = vmul.f32 %v1205_v35, %v1199_v38 }
0x1146   :  { %1209 = vrot.lane.b32.xlu0 %v1207_v39, %s2351_s3 }
0x11b8   :  { %v1210_v56 = vpop.permute.xlu0 %1209 }
0x11b9   :  { %v1212_v57 = vadd.f32 %v1210_v56, %v1202_v54 }
0x11bb   :  { %2308 = vtanh.f32 %v1212_v57 }
0x11c1   :  { %v2309_v60 = vpop.eup %2308 }
0x11c2   :  { %1215 = vrot.lane.b32.xlu1 %v2309_v60, %s2351_s3 }
0x1234   :  { %v1216_v61 = vpop.permute.xlu1 %1215 }
0x1235   :  { %v2792_v62 = vmul.f32 %v1216_v61, %v1199_v38 }
0x1237   :  { %v1225_v44 = vpack.c.bf16 %v2792_v62, %v2792_v62 }
0x1239   :  { %1227 = vrot.lane.b32.xlu2 %v1225_v44, %s2352_s21 }
0x1293   :  { %v1228_v2 = vpop.permute.xlu2 %1227 }
0x1294   :  { %2062 = vmatmul.msk.bf16.vlgmr.msrb.gmra.mxu0 %vm231_vm10, %v1228_v2  ;;  %2063 = vmatmul.msk.bf16.vlgmr.msrb.gmra.mxu1 %vm231_vm10, %v1228_v2 }
0x1295   :  { %1566 = vmatpush.bf16.msrb.mxu0 %v2700_v55  ;;  %1579 = vmatpush.bf16.msrb.mxu1 %v2708_v58 }
0x1299   :  { %1567 = vmatpush.bf16.msrb.mxu0 %v2723_v0  ;;  %1580 = vmatpush.bf16.msrb.mxu1 %v2728_v1 }
0x1311   :  { %v1241_v3 = vpop.f32.mrf.mxu0  ;;  %v1254_v4 = vpop.f32.mrf.mxu1 }
0x1312   :  { %v1260_v5 = vadd.f32 %v1258_v36, %v1241_v3  ;;  %v1261_v6 = vadd.f32 %v1259_v20, %v1254_v4 }
0x1314   :  { %v1262_v7 = vsel %vm864_vm15, %v1260_v5, %v1261_v6 }
0x1315   :  { %v1263_v9 = vsel %vm853_vm14, %v1262_v7, 0.0 }
0x1316   :  { %2310 = vtanh.f32 %v1263_v9  ;;  %v2064_v58 = vmul.f32 -1.442695, %v1263_v9 }
0x1318   :  { %2312 = vpow2.f32 %v2064_v58  ;;  %v1423_v58 = vld [vmem:[#allocation3 + $0xa] ss:$0 sm:$0xff] }
0x1319   :  { %v1243_v10 = vpop.f32.mrf.mxu0  ;;  %v1256_v14 = vpop.f32.mrf.mxu1 }
0x131a   :  { %v1422_v14 = vld [vmem:[#allocation3 + $0x5] ss:$0 sm:$0xff] }
0x131c   :  { %v2311_v55 = vpop.eup %2310 }
0x131d   :  { %1286 = vrot.lane.b32.xlu0 %v2311_v55, %s2351_s3 }
0x131e   :  { %v2313_v0 = vpop.eup %2312 }
0x131f   :  { %v1267_v1 = vadd.f32 1.0, %v2313_v0 }
0x1321   :  { %2314 = vrcp.f32 %v1267_v1  ;;  %v1279_v11 = vand.u32 2147483648, %v1267_v1  ;;  %vm1273_vm5 = vweird.f32 %v1267_v1  ;;  %v1277_v12 = vand.u32 2147483647, %v1267_v1 }
0x1323   :  { %v1280_v24 = vor.u32 1.1754944e-38, %v1279_v11  ;;  %vm1278_vm1 = vcmp.eq.f32.partialorder %v1277_v12, 8.507059e+37 }
0x1327   :  { %v2315_v15 = vpop.eup %2314 }
0x1328   :  { %v1269_v63 = vmul.f32 %v2315_v15, %v1267_v1  ;;  %vm1274_vm4 = vweird.f32 %v2315_v15 }
0x1329   :  { %vm1275_vm6 = vmor %vm1273_vm5, %vm1274_vm4 }
0x132a   :  { %v1270_v59 = vsub.f32 1.0, %v1269_v63 }
0x132c   :  { %v1271_v16 = vmul.f32 %v2315_v15, %v1270_v59 }
0x132e   :  { %v1272_v17 = vadd.f32 %v2315_v15, %v1271_v16 }
0x1330   :  { %v1276_v21 = vsel %vm1275_vm6, %v2315_v15, %v1272_v17 }
0x1331   :  { %v1281_v25 = vsel %vm1278_vm1, %v1280_v24, %v1276_v21 }
0x1332   :  { %v1284_v18 = vmul.f32 %v1281_v25, %v1212_v57 }
0x138f   :  { %v1287_v19 = vpop.permute.xlu0 %1286 }
0x1390   :  { %v1289_v27 = vmul.f32 %v1287_v19, %v1281_v25 }
0x1392   :  { %1291 = vrot.lane.b32.xlu1 %v1289_v27, %s2351_s3 }
0x1404   :  { %v1292_v28 = vpop.permute.xlu1 %1291 }
0x1405   :  { %v1294_v8 = vadd.f32 %v1292_v28, %v1284_v18 }
0x1407   :  { %2316 = vtanh.f32 %v1294_v8 }
0x140d   :  { %v2317_v29 = vpop.eup %2316 }
0x140e   :  { %1297 = vrot.lane.b32.xlu2 %v2317_v29, %s2351_s3 }
0x1468   :  { %v1298_v31 = vpop.permute.xlu2 %1297 }
0x1469   :  { %v2808_v32 = vmul.f32 %v1298_v31, %v1281_v25 }
0x146b   :  { %v1307_v33 = vpack.c.bf16 %v2808_v32, %v2808_v32 }
0x146d   :  { %1309 = vrot.lane.b32.xlu0 %v1307_v33, %s2352_s21 }
0x14df   :  { %v1310_v13 = vpop.permute.xlu0 %1309 }
0x14e0   :  { %2065 = vmatmul.msk.bf16.vlgmr.msra.gmra.mxu2 %vm231_vm10, %v1310_v13  ;;  %2066 = vmatmul.msk.bf16.vlgmr.msra.gmra.mxu3 %vm231_vm10, %v1310_v13 }
0x1563   :  { %v1323_v34 = vpop.f32.mrf.mxu2  ;;  %v1336_v41 = vpop.f32.mrf.mxu3 }
0x1564   :  { %v1342_v45 = vadd.f32 %v1340_v40, %v1323_v34  ;;  %v1343_v46 = vadd.f32 %v1341_v42, %v1336_v41 }
0x1566   :  { %v1344_v47 = vsel %vm864_vm15, %v1342_v45, %v1343_v46 }
0x1567   :  { %v1345_v48 = vsel %vm853_vm14, %v1344_v47, 0.0 }
0x1568   :  { %2318 = vtanh.f32 %v1345_v48  ;;  %v2067_v30 = vmul.f32 -1.442695, %v1345_v48 }
0x156a   :  { %2320 = vpow2.f32 %v2067_v30 }
0x156b   :  { %v1325_v49 = vpop.f32.mrf.mxu2  ;;  %v1338_v50 = vpop.f32.mrf.mxu3 }
0x156e   :  { %v2319_v51 = vpop.eup %2318 }
0x156f   :  { %1368 = vrot.lane.b32.xlu1 %v2319_v51, %s2351_s3  ;;  %v1504_v51 = vld [vmem:[#allocation3 + $0x6] ss:$0 sm:$0xff] }
0x1570   :  { %v2321_v22 = vpop.eup %2320 }
0x1571   :  { %v1349_v23 = vadd.f32 1.0, %v2321_v22  ;;  %v1505_v22 = vld [vmem:[#allocation3 + $0x9] ss:$0 sm:$0xff] }
0x1573   :  { %2322 = vrcp.f32 %v1349_v23  ;;  %v1361_v54 = vand.u32 2147483648, %v1349_v23  ;;  %vm1355_vm8 = vweird.f32 %v1349_v23  ;;  %v1359_v56 = vand.u32 2147483647, %v1349_v23 }
0x1575   :  { %v1362_v60 = vor.u32 1.1754944e-38, %v1361_v54  ;;  %vm1360_vm11 = vcmp.eq.f32.partialorder %v1359_v56, 8.507059e+37 }
0x1579   :  { %v2323_v43 = vpop.eup %2322 }
0x157a   :  { %v1351_v53 = vmul.f32 %v2323_v43, %v1349_v23  ;;  %vm1356_vm7 = vweird.f32 %v2323_v43 }
0x157b   :  { %vm1357_vm9 = vmor %vm1355_vm8, %vm1356_vm7 }
0x157c   :  { %v1352_v35 = vsub.f32 1.0, %v1351_v53 }
0x157e   :  { %v1353_v38 = vmul.f32 %v2323_v43, %v1352_v35 }
0x1580   :  { %v1354_v39 = vadd.f32 %v2323_v43, %v1353_v38 }
0x1582   :  { %v1358_v57 = vsel %vm1357_vm9, %v2323_v43, %v1354_v39  ;;  %vm2115_vm9 = vmpackc.low %vm923_vm3, %vm923_vm3 }
0x1583   :  { %v1363_v44 = vsel %vm1360_vm11, %v1362_v60, %v1358_v57 }
0x1584   :  { %v1366_v3 = vmul.f32 %v1363_v44, %v1294_v8 }
0x15e1   :  { %v1369_v61 = vpop.permute.xlu1 %1368 }
0x15e2   :  { %v1371_v2 = vmul.f32 %v1369_v61, %v1363_v44 }
0x15e4   :  { %1373 = vrot.lane.b32.xlu2 %v1371_v2, %s2351_s3 }
0x163e   :  { %v1374_v36 = vpop.permute.xlu2 %1373 }
0x163f   :  { %v1376_v4 = vadd.f32 %v1374_v36, %v1366_v3 }
0x1641   :  { %2324 = vtanh.f32 %v1376_v4 }
0x1647   :  { %v2325_v20 = vpop.eup %2324 }
0x1648   :  { %1379 = vrot.lane.b32.xlu0 %v2325_v20, %s2351_s3 }
0x16ba   :  { %v1380_v5 = vpop.permute.xlu0 %1379 }
0x16bb   :  { %v2820_v6 = vmul.f32 %v1380_v5, %v1363_v44 }
0x16bd   :  { %v1389_v7 = vpack.c.bf16 %v2820_v6, %v2820_v6 }
0x16bf   :  { %1391 = vrot.lane.b32.xlu1 %v1389_v7, %s2352_s21 }
0x1731   :  { %v1392_v9 = vpop.permute.xlu1 %1391 }
0x1732   :  { %2068 = vmatmul.msk.bf16.vlgmr.msra.gmra.mxu0 %vm231_vm10, %v1392_v9  ;;  %2069 = vmatmul.msk.bf16.vlgmr.msra.gmra.mxu1 %vm231_vm10, %v1392_v9 }
0x17af   :  { %v1405_v10 = vpop.f32.mrf.mxu0  ;;  %v1418_v55 = vpop.f32.mrf.mxu1 }
0x17b0   :  { %v1424_v0 = vadd.f32 %v1422_v14, %v1405_v10  ;;  %v1425_v1 = vadd.f32 %v1423_v58, %v1418_v55 }
0x17b2   :  { %v1426_v15 = vsel %vm864_vm15, %v1424_v0, %v1425_v1 }
0x17b3   :  { %v1427_v63 = vsel %vm853_vm14, %v1426_v15, 0.0 }
0x17b4   :  { %2326 = vtanh.f32 %v1427_v63  ;;  %v2070_v11 = vmul.f32 -1.442695, %v1427_v63 }
0x17b6   :  { %2328 = vpow2.f32 %v2070_v11  ;;  %v1586_v11 = vld [vmem:[#allocation3 + $0x7] ss:$0 sm:$0xff] }
0x17b7   :  { %v1407_v59 = vpop.f32.mrf.mxu0  ;;  %v1420_v16 = vpop.f32.mrf.mxu1 }
0x17ba   :  { %v2327_v17 = vpop.eup %2326 }
0x17bb   :  { %1450 = vrot.lane.b32.xlu2 %v2327_v17, %s2351_s3 }
0x17bc   :  { %v2329_v12 = vpop.eup %2328 }
0x17bd   :  { %v1431_v21 = vadd.f32 1.0, %v2329_v12 }
0x17bf   :  { %2330 = vrcp.f32 %v1431_v21  ;;  %v1443_v28 = vand.u32 2147483648, %v1431_v21  ;;  %vm1437_vm13 = vweird.f32 %v1431_v21  ;;  %v1441_v8 = vand.u32 2147483647, %v1431_v21 }
0x17c1   :  { %v1444_v31 = vor.u32 1.1754944e-38, %v1443_v28  ;;  %vm1442_vm2 = vcmp.eq.f32.partialorder %v1441_v8, 8.507059e+37 }
0x17c5   :  { %v2331_v24 = vpop.eup %2330 }
0x17c6   :  { %v1433_v19 = vmul.f32 %v2331_v24, %v1431_v21  ;;  %vm1438_vm12 = vweird.f32 %v2331_v24  ;;  %v1587_v21 = vld [vmem:[#allocation3 + $0x8] ss:$0 sm:$0xff] }
0x17c7   :  { %vm1439_vm0 = vmor %vm1437_vm13, %vm1438_vm12 }
0x17c8   :  { %v1434_v25 = vsub.f32 1.0, %v1433_v19 }
0x17ca   :  { %v1435_v27 = vmul.f32 %v2331_v24, %v1434_v25 }
0x17cc   :  { %v1436_v18 = vadd.f32 %v2331_v24, %v1435_v27 }
0x17ce   :  { %v1440_v29 = vsel %vm1439_vm0, %v2331_v24, %v1436_v18 }
0x17cf   :  { %v1445_v13 = vsel %vm1442_vm2, %v1444_v31, %v1440_v29 }
0x17d0   :  { %v1448_v40 = vmul.f32 %v1445_v13, %v1376_v4 }
0x1815   :  { %v1451_v33 = vpop.permute.xlu2 %1450 }
0x1816   :  { %v1453_v34 = vmul.f32 %v1451_v33, %v1445_v13 }
0x1818   :  { %1455 = vrot.lane.b32.xlu0 %v1453_v34, %s2351_s3 }
0x188a   :  { %v1456_v41 = vpop.permute.xlu0 %1455 }
0x188b   :  { %v1458_v42 = vadd.f32 %v1456_v41, %v1448_v40 }
0x188d   :  { %2332 = vtanh.f32 %v1458_v42 }
0x1893   :  { %v2333_v45 = vpop.eup %2332 }
0x1894   :  { %1461 = vrot.lane.b32.xlu1 %v2333_v45, %s2351_s3 }
0x1906   :  { %v1462_v46 = vpop.permute.xlu1 %1461 }
0x1907   :  { %v2832_v47 = vmul.f32 %v1462_v46, %v1445_v13 }
0x1909   :  { %v1471_v48 = vpack.c.bf16 %v2832_v47, %v2832_v47 }
0x190b   :  { %1473 = vrot.lane.b32.xlu2 %v1471_v48, %s2352_s21 }
0x1965   :  { %v1474_v49 = vpop.permute.xlu2 %1473 }
0x1966   :  { %2071 = vmatmul.msk.bf16.vlgmr.msrb.gmra.mxu2 %vm231_vm10, %v1474_v49  ;;  %2072 = vmatmul.msk.bf16.vlgmr.msrb.gmra.mxu3 %vm231_vm10, %v1474_v49 }
0x19e9   :  { %v1487_v50 = vpop.f32.mrf.mxu2  ;;  %v1500_v30 = vpop.f32.mrf.mxu3 }
0x19ea   :  { %v1506_v23 = vadd.f32 %v1504_v51, %v1487_v50  ;;  %v1507_v43 = vadd.f32 %v1505_v22, %v1500_v30  ;;  %v2354_v22 = vmov 0.0  }
0x19eb   :  { %961 = vst.msk [vmem:[#allocation4 + $0x30] sm:$0xff] %vm231_vm10, %v2354_v22 }
0x19ec   :  { %v1508_v53 = vsel %vm864_vm15, %v1506_v23, %v1507_v43  ;;  %955 = vst.msk [vmem:[#allocation4] sm:$0xff] %vm231_vm10, %v2354_v22 }
0x19ed   :  { %v1509_v35 = vsel %vm853_vm14, %v1508_v53, 0.0  ;;  %956 = vst.msk [vmem:[#allocation4 + $0x8] sm:$0xff] %vm231_vm10, %v2354_v22 }
0x19ee   :  { %2334 = vtanh.f32 %v1509_v35  ;;  %v2073_v56 = vmul.f32 -1.442695, %v1509_v35  ;;  %957 = vst.msk [vmem:[#allocation4 + $0x10] sm:$0xff] %vm231_vm10, %v2354_v22 }
0x19ef   :  { %958 = vst.msk [vmem:[#allocation4 + $0x18] sm:$0xff] %vm231_vm10, %v2354_v22 }
0x19f0   :  { %2336 = vpow2.f32 %v2073_v56  ;;  %959 = vst.msk [vmem:[#allocation4 + $0x20] sm:$0xff] %vm231_vm10, %v2354_v22 }
0x19f1   :  { %v1489_v38 = vpop.f32.mrf.mxu2  ;;  %v1502_v39 = vpop.f32.mrf.mxu3  ;;  %960 = vst.msk [vmem:[#allocation4 + $0x28] sm:$0xff] %vm231_vm10, %v2354_v22 }
0x19f2   :  { %962 = vst.msk [vmem:[#allocation4 + $0x38] sm:$0xff] %vm231_vm10, %v2354_v22 }
0x19f4   :  { %v2335_v54 = vpop.eup %2334 }
0x19f5   :  { %1532 = vrot.lane.b32.xlu0 %v2335_v54, %s2351_s3 }
0x19f6   :  { %v2337_v57 = vpop.eup %2336 }
0x19f7   :  { %v1513_v60 = vadd.f32 1.0, %v2337_v57 }
0x19f9   :  { %2338 = vrcp.f32 %v1513_v60  ;;  %v1525_v4 = vand.u32 2147483648, %v1513_v60  ;;  %vm1519_vm5 = vweird.f32 %v1513_v60  ;;  %v1523_v20 = vand.u32 2147483647, %v1513_v60 }
0x19fb   :  { %v1526_v7 = vor.u32 1.1754944e-38, %v1525_v4  ;;  %vm1524_vm1 = vcmp.eq.f32.partialorder %v1523_v20, 8.507059e+37  ;;  %v1681_v4 = vld [vmem:[%s2984_s8] sm:$0xff] }
0x19fc   :  { %v1643_v20 = vld [vmem:[%s2985_s7] sm:$0xff] }
0x19ff   :  { %v2339_v61 = vpop.eup %2338 }
0x1a00   :  { %v1515_v44 = vmul.f32 %v2339_v61, %v1513_v60  ;;  %vm1520_vm4 = vweird.f32 %v2339_v61 }
0x1a01   :  { %vm1521_vm6 = vmor %vm1519_vm5, %vm1520_vm4 }
0x1a02   :  { %v1516_v2 = vsub.f32 1.0, %v1515_v44 }
0x1a04   :  { %v1517_v3 = vmul.f32 %v2339_v61, %v1516_v2 }
0x1a06   :  { %v1518_v36 = vadd.f32 %v2339_v61, %v1517_v3 }
0x1a08   :  { %v1522_v5 = vsel %vm1521_vm6, %v2339_v61, %v1518_v36 }
0x1a09   :  { %v1527_v10 = vsel %vm1524_vm1, %v1526_v7, %v1522_v5  ;;  %v1682_v7 = vld [vmem:[%s2984_s8 + $0x8] sm:$0xff] }
0x1a0a   :  { %v1530_v55 = vmul.f32 %v1527_v10, %v1458_v42 }
0x1a67   :  { %v1533_v9 = vpop.permute.xlu0 %1532 }
0x1a68   :  { %v1535_v14 = vmul.f32 %v1533_v9, %v1527_v10  ;;  %v1644_v9 = vld [vmem:[%s2985_s7 + $0x8] sm:$0xff] }
0x1a6a   :  { %1537 = vrot.lane.b32.xlu1 %v1535_v14, %s2351_s3  ;;  %v1645_v14 = vld [vmem:[%s2985_s7 + $0x10] sm:$0xff] }
0x1adc   :  { %v1538_v58 = vpop.permute.xlu1 %1537 }
0x1add   :  { %v1540_v0 = vadd.f32 %v1538_v58, %v1530_v55  ;;  %v2183_v55 = vld [vmem:[%s2986_s9 + $0x38] sm:$0xff]  ;;  %v2182_v58 = vld [vmem:[%s2986_s9 + $0x30] sm:$0xff] }
0x1ade   :  { %1807 = vmatpush.bf16.msra.mxu0 %v2183_v55 }
0x1adf   :  { %2340 = vtanh.f32 %v1540_v0 }
0x1ae2   :  { %1808 = vmatpush.bf16.msra.mxu0 %v2182_v58 }
0x1ae5   :  { %v2341_v1 = vpop.eup %2340 }
0x1ae6   :  { %1543 = vrot.lane.b32.xlu2 %v2341_v1, %s2351_s3  ;;  %v2180_v1 = vld [vmem:[%s2986_s9 + $0x20] sm:$0xff] }
0x1b40   :  { %v1544_v15 = vpop.permute.xlu2 %1543 }
0x1b41   :  { %v1546_v63 = vmul.f32 %v1544_v15, %v1527_v10  ;;  %v1683_v10 = vld [vmem:[%s2984_s8 + $0x10] sm:$0xff]  ;;  %v2179_v15 = vld [vmem:[%s2986_s9 + $0x18] sm:$0xff] }
0x1b43   :  { %v1553_v59 = vpack.c.bf16 %v1546_v63, %v1546_v63 }
0x1b45   :  { %1555 = vrot.lane.b32.xlu0 %v1553_v59, %s2352_s21  ;;  %v2178_v59 = vld [vmem:[%s2986_s9 + $0x10] sm:$0xff] }
0x1bb7   :  { %v1556_v16 = vpop.permute.xlu0 %1555 }
0x1bb8   :  { %2074 = vmatmul.msk.bf16.vlgmr.msrb.gmra.mxu0 %vm231_vm10, %v1556_v16  ;;  %2075 = vmatmul.msk.bf16.vlgmr.msrb.gmra.mxu1 %vm231_vm10, %v1556_v16  ;;  %v2177_v16 = vld [vmem:[%s2986_s9 + $0x8] sm:$0xff] }
0x1c35   :  { %v1569_v17 = vpop.f32.mrf.mxu0  ;;  %v1582_v12 = vpop.f32.mrf.mxu1 }
0x1c36   :  { %v1588_v24 = vadd.f32 %v1586_v11, %v1569_v17  ;;  %v1589_v19 = vadd.f32 %v1587_v21, %v1582_v12  ;;  %v2176_v21 = vld [vmem:[%s2986_s9] sm:$0xff] }
0x1c38   :  { %v1590_v25 = vsel %vm864_vm15, %v1588_v24, %v1589_v19  ;;  %v2191_v19 = vld [vmem:[%s2988_s11 + $0x38] sm:$0xff] }
0x1c39   :  { %v1591_v27 = vsel %vm853_vm14, %v1590_v25, 0.0  ;;  %1898 = vmatpush.bf16.msra.mxu1 %v2191_v19  ;;  %v2190_v25 = vld [vmem:[%s2988_s11 + $0x30] sm:$0xff] }
0x1c3a   :  { %2342 = vtanh.f32 %v1591_v27  ;;  %v2076_v29 = vmul.f32 -1.442695, %v1591_v27  ;;  %v2189_v27 = vld [vmem:[%s2988_s11 + $0x28] sm:$0xff] }
0x1c3c   :  { %2344 = vpow2.f32 %v2076_v29 }
0x1c3d   :  { %v1571_v18 = vpop.f32.mrf.mxu0  ;;  %v1584_v28 = vpop.f32.mrf.mxu1  ;;  %1899 = vmatpush.bf16.msra.mxu1 %v2190_v25 }
0x1c40   :  { %v2343_v8 = vpop.eup %2342 }
0x1c41   :  { %1614 = vrot.lane.b32.xlu1 %v2343_v8, %s2351_s3  ;;  %1900 = vmatpush.bf16.msra.mxu1 %v2189_v27  ;;  %v2188_v8 = vld [vmem:[%s2988_s11 + $0x20] sm:$0xff] }
0x1c42   :  { %v2345_v31 = vpop.eup %2344 }
0x1c43   :  { %v1595_v33 = vadd.f32 1.0, %v2345_v31 }
0x1c45   :  { %2346 = vrcp.f32 %v1595_v33  ;;  %v1607_v45 = vand.u32 2147483648, %v1595_v33  ;;  %vm1601_vm15 = vweird.f32 %v1595_v33  ;;  %v1605_v46 = vand.u32 2147483647, %v1595_v33  ;;  %1901 = vmatpush.bf16.msra.mxu1 %v2188_v8 }
0x1c47   :  { %v1608_v49 = vor.u32 1.1754944e-38, %v1607_v45  ;;  %vm1606_vm8 = vcmp.eq.f32.partialorder %v1605_v46, 8.507059e+37  ;;  %v2187_v46 = vld [vmem:[%s2988_s11 + $0x18] sm:$0xff] }
0x1c49   :  { %1902 = vmatpush.bf16.msra.mxu1 %v2187_v46 }
0x1c4b   :  { %v2347_v13 = vpop.eup %2346 }
0x1c4c   :  { %v1597_v34 = vmul.f32 %v2347_v13, %v1595_v33  ;;  %vm1602_vm7 = vweird.f32 %v2347_v13 }
0x1c4d   :  { %vm1603_vm14 = vmor %vm1601_vm15, %vm1602_vm7 }
0x1c4e   :  { %v1598_v40 = vsub.f32 1.0, %v1597_v34 }
0x1c50   :  { %v1599_v41 = vmul.f32 %v2347_v13, %v1598_v40 }
0x1c52   :  { %v1600_v42 = vadd.f32 %v2347_v13, %v1599_v41 }
0x1c54   :  { %v1604_v48 = vsel %vm1603_vm14, %v2347_v13, %v1600_v42 }
0x1c55   :  { %v1609_v51 = vsel %vm1606_vm8, %v1608_v49, %v1604_v48  ;;  %v2186_v48 = vld [vmem:[%s2988_s11 + $0x10] sm:$0xff]  ;;  %v2185_v49 = vld [vmem:[%s2988_s11 + $0x8] sm:$0xff] }
0x1c56   :  { %1903 = vmatpush.bf16.msra.mxu1 %v2186_v48 }
0x1c5a   :  { %1904 = vmatpush.bf16.msra.mxu1 %v2185_v49 }
0x1cb3   :  { %v1615_v50 = vpop.permute.xlu1 %1614 }
0x1cb4   :  { %v1617_v30 = vmul.f32 %v1615_v50, %v1609_v51  ;;  %v2184_v50 = vld [vmem:[%s2988_s11] sm:$0xff] }
0x1cb5   :  { %1905 = vmatpush.bf16.msra.mxu1 %v2184_v50 }
0x1cb6   :  { %1619 = vrot.lane.b32.xlu2 %v1617_v30, %s2351_s3  ;;  %v2204_v30 = vld [vmem:[%s2987_s10] ss:$0 sm:$0xff] }
0x1cbe   :  { %1548 = vrot.lane.b32.xlu2 %v1546_v63, %s2352_s21 }
0x1cc6   :  { %1302 = vrot.lane.b32.xlu2 %v2808_v32, %s2352_s21  ;;  %v1612_v32 = vmul.f32 %v1609_v51, %v1540_v0  ;;  %v2181_v0 = vld [vmem:[%s2986_s9 + $0x28] sm:$0xff] }
0x1cc7   :  { %1809 = vmatpush.bf16.msra.mxu0 %v2181_v0 }
0x1ccb   :  { %1810 = vmatpush.bf16.msra.mxu0 %v2180_v1 }
0x1cce   :  { %1057 = vrot.lane.b32.xlu2 %v2760_v52, %s2352_s21 }
0x1ccf   :  { %1811 = vmatpush.bf16.msra.mxu0 %v2179_v15 }
0x1cd3   :  { %1812 = vmatpush.bf16.msra.mxu0 %v2178_v59 }
0x1cd7   :  { %1813 = vmatpush.bf16.msra.mxu0 %v2177_v16 }
0x1cdb   :  { %1814 = vmatpush.bf16.msra.mxu0 %v2176_v21 }
0x1d10   :  { %v1620_v23 = vpop.permute.xlu2 %1619 }
0x1d11   :  { %v1622_v52 = vadd.f32 %v1620_v23, %v1612_v32 }
0x1d13   :  { %2348 = vtanh.f32 %v1622_v52 }
0x1d18   :  { %v1549_v43 = vpop.permute.xlu2 %1548 }
0x1d19   :  { %v2349_v53 = vpop.eup %2348  ;;  %1552 = vst.msk [vmem:[#allocation4 + $0x30] sm:$0xff] %vm231_vm10, %v1549_v43 }
0x1d1a   :  { %1625 = vrot.lane.b32.xlu0 %v2349_v53, %s2351_s3 }
0x1d20   :  { %v1303_v35 = vpop.permute.xlu2 %1302  ;;  %v1641_v61 = vld [vmem:[#allocation4 + $0x30] sm:$0xff] }
0x1d21   :  { %1306 = vst.msk [vmem:[#allocation4 + $0x18] sm:$0xff] %vm231_vm10, %v1303_v35 }
0x1d22   :  { %1466 = vrot.lane.b32.xlu0 %v2832_v47, %s2352_s21 }
0x1d28   :  { %v1058_v38 = vpop.permute.xlu2 %1057 }
0x1d29   :  { %1060 = vst.msk [vmem:[#allocation4] sm:$0xff] %vm231_vm10, %v1058_v38 }
0x1d2a   :  { %1220 = vrot.lane.b32.xlu0 %v2792_v62, %s2352_s21 }
0x1d30   :  { %v1635_v5 = vld [vmem:[#allocation4] sm:$0xff] }
0x1d8c   :  { %v1626_v39 = vpop.permute.xlu0 %1625 }
0x1d8d   :  { %v1628_v54 = vmul.f32 %v1626_v39, %v1609_v51 }
0x1d8f   :  { %1630 = vrot.lane.b32.xlu1 %v1628_v54, %s2352_s21 }
0x1d94   :  { %v1467_v56 = vpop.permute.xlu0 %1466 }
0x1d95   :  { %1470 = vst.msk [vmem:[#allocation4 + $0x28] sm:$0xff] %vm231_vm10, %v1467_v56 }
0x1d97   :  { %1384 = vrot.lane.b32.xlu1 %v2820_v6, %s2352_s21 }
0x1d9c   :  { %v1221_v57 = vpop.permute.xlu0 %1220  ;;  %v1640_v44 = vld [vmem:[#allocation4 + $0x28] sm:$0xff] }
0x1d9d   :  { %1224 = vst.msk [vmem:[#allocation4 + $0x10] sm:$0xff] %vm231_vm10, %v1221_v57  ;;  %v1917_v57 = vand.u32 127, %v206_v37 }
0x1d9f   :  { %1138 = vrot.lane.b32.xlu1 %v2776_v26, %s2352_s21  ;;  %v1638_v26 = vld [vmem:[#allocation4 + $0x18] sm:$0xff] }
0x1da4   :  { %v1637_v3 = vld [vmem:[#allocation4 + $0x10] sm:$0xff] }
0x1e01   :  { %v1631_v47 = vpop.permute.xlu1 %1630 }
0x1e02   :  { %1634 = vst.msk [vmem:[#allocation4 + $0x38] sm:$0xff] %vm231_vm10, %v1631_v47  ;;  %v2205_v47 = vld [vmem:[%s2989_s12] ss:$0 sm:$0xff] }
0x1e09   :  { %v1385_v62 = vpop.permute.xlu1 %1384  ;;  %v1642_v60 = vld [vmem:[#allocation4 + $0x38] sm:$0xff] }
0x1e0a   :  { %1388 = vst.msk [vmem:[#allocation4 + $0x20] sm:$0xff] %vm231_vm10, %v1385_v62  ;;  %1663 = vmatpush.msra.mxu2 %v1642_v60  ;;  %1701 = vmatpush.msra.mxu3 %v1642_v60 }
0x1e0c   :  { %1664 = vmatpush.msra.mxu2 %v1641_v61  ;;  %1702 = vmatpush.msra.mxu3 %v1641_v61 }
0x1e0e   :  { %1665 = vmatpush.msra.mxu2 %v1640_v44  ;;  %1703 = vmatpush.msra.mxu3 %v1640_v44 }
0x1e11   :  { %v1139_v6 = vpop.permute.xlu1 %1138  ;;  %v1639_v2 = vld [vmem:[#allocation4 + $0x20] sm:$0xff] }
0x1e12   :  { %1142 = vst.msk [vmem:[#allocation4 + $0x8] sm:$0xff] %vm231_vm10, %v1139_v6  ;;  %1666 = vmatpush.msra.mxu2 %v1639_v2  ;;  %1704 = vmatpush.msra.mxu3 %v1639_v2 }
0x1e14   :  { %1667 = vmatpush.msra.mxu2 %v1638_v26  ;;  %1705 = vmatpush.msra.mxu3 %v1638_v26 }
0x1e16   :  { %1668 = vmatpush.msra.mxu2 %v1637_v3  ;;  %1706 = vmatpush.msra.mxu3 %v1637_v3 }
0x1e19   :  { %v1636_v36 = vld [vmem:[#allocation4 + $0x8] sm:$0xff] }
0x1e1a   :  { %1669 = vmatpush.msra.mxu2 %v1636_v36  ;;  %1707 = vmatpush.msra.mxu3 %v1636_v36 }
0x1e1c   :  { %1670 = vmatpush.msra.mxu2 %v1635_v5  ;;  %1708 = vmatpush.msra.mxu3 %v1635_v5 }
0x1e1d   :  { %2080 = vmatmul.msk.f32.vlgmr.msra.gmra.mxu3 %vm923_vm3, %v1681_v4  ;;  %2077 = vmatmul.msk.f32.vlgmr.msra.gmra.mxu2 %vm923_vm3, %v1643_v20 }
0x1e25   :  { %2081 = vmatmul.msk.f32.gmra.mxu3 %vm923_vm3, %v1682_v7  ;;  %2078 = vmatmul.msk.f32.gmra.mxu2 %vm923_vm3, %v1644_v9 }
0x1e2d   :  { %2082 = vmatmul.msk.f32.gmra.mxu3 %vm923_vm3, %v1683_v10  ;;  %2079 = vmatmul.msk.f32.gmra.mxu2 %vm923_vm3, %v1645_v14 }
0x1ea0   :  { %v1710_v63 = vpop.f32.mrf.mxu3  ;;  %v1672_v24 = vpop.f32.mrf.mxu2 }
0x1ea8   :  { %v1713_v17 = vpop.f32.mrf.mxu3  ;;  %v1675_v28 = vpop.f32.mrf.mxu2 }
0x1ea9   :  { %v2199_v11 = vpack.i.bf16 %v1713_v17, %v1710_v63 }
0x1eab   :  { %2200 = vrot.lane.b32.xlu0 %v2199_v11, %s2351_s3 }
0x1eb0   :  { %v1716_v12 = vpop.f32.mrf.mxu3  ;;  %v1678_v41 = vpop.f32.mrf.mxu2 }
0x1eb1   :  { %1726 = vrot.lane.b32.xlu1 %v1716_v12, %s2351_s3 }
0x1f1d   :  { %v2201_v18 = vpop.permute.xlu0 %2200 }
0x1f1e   :  { %v2203_v29 = vunpack.i.h.bf16 %v2201_v18  ;;  %v2202_v31 = vunpack.i.l.bf16 %v2201_v18 }
0x1f20   :  { %v1731_v33 = vsel %vm231_vm10, %v1672_v24, %v2202_v31  ;;  %v1732_v13 = vsel %vm231_vm10, %v1675_v28, %v2203_v29 }
0x1f21   :  { %v2116_v34 = vpack.c.bf16 %v1732_v13, %v1731_v33 }
0x1f23   :  { %2117 = vmatmul.msk.bf16.vlgmr.msra.gmra.mxu0 %vm2115_vm9, %v2116_v34  ;;  %v1727_v40 = vpop.permute.xlu1 %1726 }
0x1f24   :  { %v1733_v42 = vsel %vm231_vm10, %v1678_v41, %v1727_v40  ;;  %vm1918_vm10 = vcmp.eq.s32.totalorder %v1917_v57, 0 }
0x1f25   :  { %v2119_v45 = vpack.c.bf16 %v1733_v42, %v1733_v42 }
0x1f33   :  { %2120 = vmatmul.msk.bf16.gmra.mxu0 %vm2115_vm9, %v2119_v45 }
0x1fa0   :  { %v1816_v51 = vpop.f32.mrf.mxu0 }
0x1fa1   :  { %v1817_v22 = vadd.f32 %v2204_v30, %v1816_v51 }
0x1fa3   :  { %v1825_v52 = vmax.f32 %v1817_v22, 0.0 }
0x1fa8   :  { %v1818_v32 = vpop.f32.mrf.mxu0 }
0x1fa9   :  { %v1819_v23 = vadd.f32 %v2204_v30, %v1818_v32 }
0x1fab   :  { %v1826_v43 = vmax.f32 %v1819_v23, 0.0 }
0x1fad   :  { %v1828_v53 = vpack.c.bf16 %v1826_v43, %v1825_v52 }
0x1faf   :  { %1906 = vmatmul.bf16.vlgmr.msra.gmra.mxu1 %v1828_v53 }
0x1fb0   :  { %v1821_v35 = vpop.f32.mrf.mxu0 }
0x1fb1   :  { %v1822_v38 = vadd.f32 %v2204_v30, %v1821_v35 }
0x1fb3   :  { %v1827_v39 = vmax.f32 %v1822_v38, 0.0 }
0x1fb5   :  { %v1829_v56 = vpack.c.bf16 %v1827_v39, %v1827_v39 }
0x1fb8   :  { %v1823_v54 = vpop.f32.mrf.mxu0 }
0x1fbf   :  { %1911 = vmatmul.bf16.gmra.mxu1 %v1829_v56 }
0x202c   :  { %v1907_v62 = vpop.f32.mrf.mxu1 }
0x202d   :  { %v1908_v60 = vadd.f32 %v2205_v47, %v1907_v62 }
0x202f   :  { %v1919_v61 = vsel %vm1918_vm10, 0.0, %v1908_v60 }
0x2030   :  { %1922 = vst [vmem:[%s2990_s13] sm:$0xff] %v1919_v61 }
0x2034   :  { %v1909_v44 = vpop.f32.mrf.mxu1 }
0x2035   :  { %v1910_v6 = vadd.f32 %v2205_v47, %v1909_v44 }
0x2037   :  { %v1920_v2 = vsel %vm1918_vm10, 0.0, %v1910_v6 }
0x2038   :  { %1923 = vst [vmem:[%s2990_s13 + $0x8] sm:$0xff] %v1920_v2 }
0x203c   :  { %v1912_v37 = vpop.f32.mrf.mxu1 }
0x203d   :  { %v1913_v26 = vadd.f32 %v2205_v47, %v1912_v37 }
0x203f   :  { %v1921_v3 = vsel %vm1918_vm10, 0.0, %v1913_v26 }
0x2040   :  { %1924 = vst [vmem:[%s2990_s13 + $0x10] sm:$0xff] %v1921_v3 }
0x2044   :  { %v1914_v36 = vpop.f32.mrf.mxu1 }

</bundles_post_ra>
